<compile_context>
chip_gen: v5e
topology: v5e:2x2
jax: 0.10.0
libtpu: 0.0.40
codegen_flags: <defaults>
</compile_context>

<pallas_src>
import math
from functools import partial

import jax
import jax.numpy as jnp
from jax import lax
from jax.experimental import pallas as pl
from jax.experimental.pallas import tpu as pltpu

_EPS = 1e-5
_INV_SQRT2 = 1.0 / math.sqrt(2.0)
_LANE = 128
_MIB = 1024 * 1024


def _pair(v):
    if isinstance(v, (tuple, list)):
        return (int(v[0]), int(v[1]))
    return (int(v), int(v))


def _round_up(x, m):
    return ((x + m - 1) // m) * m


def _padded_bytes(shape, dtype):
    """Rough VMEM footprint of one block (lane/sublane padded)."""
    itemsize = jnp.dtype(dtype).itemsize
    if len(shape) == 0:
        return 4
    if len(shape) == 1:
        return _round_up(int(shape[0]), _LANE) * itemsize
    lead = 1
    for d in shape[:-2]:
        lead *= int(d)
    return lead * _round_up(int(shape[-2]), 8) * _round_up(int(shape[-1]), _LANE) * itemsize


def _vmem_limit(est_bytes):
    try:
        cap = int(getattr(pltpu.get_tpu_info(), "vmem_capacity_bytes", 0)) or 128 * _MIB
    except Exception:
        cap = 128 * _MIB
    return int(min(0.75 * cap, max(32 * _MIB, 1.5 * est_bytes)))


# ---------------------------------------------------------------------------
# Kernel 1: direct conv via in-VMEM im2col + one wide MXU dot, plus per-image
# partial BN statistics.  grid = (N,), fully "parallel".
# ---------------------------------------------------------------------------
def _make_conv_stats_kernel(KH, KW, SH, SW, DH, DW, OH, OW, Cin, Cout):
    OHW = OH * OW
    K = KH * KW * Cin

    def kernel(x_ref, w_ref, y_ref, sum_ref, sq_ref, patch_ref):
        # ---- in-kernel im2col: KH*KW shifted 3-D slices -> [OH, OW, K] ----
        for kh in range(KH):
            for kw in range(KW):
                h0, w0 = kh * DH, kw * DW
                dsh = pl.ds(h0, OH) if SH == 1 else pl.ds(h0, OH, SH)
                dsw = pl.ds(w0, OW) if SW == 1 else pl.ds(w0, OW, SW)
                c0 = (kh * KW + kw) * Cin
                patch_ref[:, :, pl.ds(c0, Cin)] = x_ref[0, dsh, dsw, :]

        # ---- single wide dot: [OHW, K] x [K, Coutp], f32 accumulation ----
        patches = patch_ref[...].reshape(OHW, K)
        acc = jnp.dot(patches, w_ref[...], preferred_element_type=jnp.float32)

        # y stored unpadded (last dim == Cout) to minimise HBM traffic.
        y_ref[0] = acc[:, :Cout]

        # Per-image partial BN statistics (reduced in the wrapper), so the
        # grid axis needs no resident accumulator and stays "parallel".
        sum_ref[0] = jnp.sum(acc, axis=0, keepdims=True)
        sq_ref[0] = jnp.sum(acc * acc, axis=0, keepdims=True)

    return kernel


# ---------------------------------------------------------------------------
# Kernel 2: fused affine BN (precomputed scale/shift) + exact (erf) GELU.
# Flattened, lane-dense, large row tiles; purely mem-bound.
# ---------------------------------------------------------------------------
def _bn_gelu_kernel(y_ref, scale_ref, shift_ref, o_ref):
    z = y_ref[...] * scale_ref[...] + shift_ref[...]
    o_ref[...] = z * 0.5 * (1.0 + lax.erf(z * _INV_SQRT2))


# ---------------------------------------------------------------------------
# Host glue (jitted so layout plumbing fuses into single XLA passes)
# ---------------------------------------------------------------------------
@partial(jax.jit, static_argnames=("stride", "padding", "dilation", "groups",
                                   "bn_act", "use_bf16"))
def conv_forward(x, conv_w, gamma, beta, *, stride=(1, 1), padding=(0, 0),
                 dilation=(1, 1), groups=1, bn_act=False, use_bf16=True):
    """Forward pass of the PyTorch `Conv` module (bias=False)."""
    assert groups == 1  # TODO(synk): grouped conv needs per-group GEMMs.
    SH, SW = _pair(stride)
    PH, PW = _pair(padding)
    DH, DW = _pair(dilation)

    N, Cin, H, W = x.shape
    Cout = conv_w.shape[0]
    KH, KW = conv_w.shape[2], conv_w.shape[3]
    OH = (H + 2 * PH - DH * (KH - 1) - 1) // SH + 1
    OW = (W + 2 * PW - DW * (KW - 1) - 1) // SW + 1
    OHW = OH * OW
    M = N * OHW
    K = KH * KW * Cin
    Coutp = _round_up(Cout, _LANE)          # lane-dense GEMM N dimension

    compute_dtype = jnp.bfloat16 if use_bf16 else jnp.float32

    # NHWC, spatially padded input, read directly by the kernel (no host im2col).
    xp = jnp.pad(jnp.transpose(x, (0, 2, 3, 1)).astype(compute_dtype),
                 ((0, 0), (PH, PH), (PW, PW), (0, 0)))
    Hp, Wp = H + 2 * PH, W + 2 * PW

    # Weight as a single [K, Coutp] GEMM operand, zero-padded on the lane dim.
    w2 = jnp.transpose(conv_w, (2, 3, 1, 0)).astype(compute_dtype).reshape(K, Cout)
    w2 = jnp.pad(w2, ((0, 0), (0, Coutp - Cout)))

    conv_kernel = _make_conv_stats_kernel(KH, KW, SH, SW, DH, DW,
                                          OH, OW, Cin, Cout)

    est1 = (2 * _padded_bytes((1, Hp, Wp, Cin), compute_dtype)   # x block (dbl-buffered)
            + 2 * _padded_bytes((K, Coutp), compute_dtype)       # weight
            + 2 * _padded_bytes((1, OHW, Cout), jnp.float32)     # y block
            + 4 * _padded_bytes((1, 1, Coutp), jnp.float32)      # stats blocks
            + _padded_bytes((OH, OW, K), compute_dtype)          # im2col scratch
            + _padded_bytes((OHW, K), compute_dtype)             # patches temp
            + 2 * _padded_bytes((OHW, Coutp), jnp.float32))      # acc temps

    y, s, sq = pl.pallas_call(
        conv_kernel,
        out_shape=(
            jax.ShapeDtypeStruct((N, OHW, Cout), jnp.float32),
            jax.ShapeDtypeStruct((N, 1, Coutp), jnp.float32),
            jax.ShapeDtypeStruct((N, 1, Coutp), jnp.float32),
        ),
        grid=(N,),
        in_specs=[
            pl.BlockSpec((1, Hp, Wp, Cin), lambda n: (n, 0, 0, 0)),
            pl.BlockSpec((K, Coutp), lambda n: (0, 0)),
        ],
        out_specs=(
            pl.BlockSpec((1, OHW, Cout), lambda n: (n, 0, 0)),
            pl.BlockSpec((1, 1, Coutp), lambda n: (n, 0, 0)),
            pl.BlockSpec((1, 1, Coutp), lambda n: (n, 0, 0)),
        ),
        scratch_shapes=[pltpu.VMEM((OH, OW, K), compute_dtype)],
        compiler_params=pltpu.CompilerParams(
            dimension_semantics=("parallel",),
            vmem_limit_bytes=_vmem_limit(est1)),
    )(xp, w2)

    if not bn_act:
        out3 = y
    else:
        # Training-mode BatchNorm: batch mean / biased variance per channel.
        s_c = jnp.sum(s, axis=(0, 1))[:Cout]
        sq_c = jnp.sum(sq, axis=(0, 1))[:Cout]
        mean = s_c / M
        var = jnp.maximum(sq_c / M - mean * mean, 0.0)   # guard cancellation
        scale = gamma.astype(jnp.float32) / jnp.sqrt(var + _EPS)
        shift = beta.astype(jnp.float32) - mean * scale

        # Re-group rows so the elementwise pass is lane-dense without padding:
        # (M, Cout) -> (M // r, r * Cout) with r * Cout == 128 when possible.
        r = 1
        if Cout < _LANE and _LANE % Cout == 0 and M % (_LANE // Cout) == 0:
            r = _LANE // Cout
        M2, C2 = M // r, r * Cout
        y2 = y.reshape(M2, C2)
        scale2 = jnp.tile(scale.reshape(1, Cout), (1, r))
        shift2 = jnp.tile(shift.reshape(1, Cout), (1, r))

        # Large flattened row tiles (mem-bound pass wants >= 512 rows/step).
        TM = M2
        for cand in (2048, 1024, 512, 256, 128, 64, 32, 16, 8):
            if M2 >= cand and M2 % cand == 0:
                TM = cand
                break

        est2 = (4 * _padded_bytes((TM, C2), jnp.float32)
                + 4 * _padded_bytes((1, C2), jnp.float32))

        out2 = pl.pallas_call(
            _bn_gelu_kernel,
            out_shape=jax.ShapeDtypeStruct((M2, C2), jnp.float32),
            grid=(M2 // TM,),
            in_specs=[
                pl.BlockSpec((TM, C2), lambda i: (i, 0)),
                pl.BlockSpec((1, C2), lambda i: (0, 0)),
                pl.BlockSpec((1, C2), lambda i: (0, 0)),
            ],
            out_specs=pl.BlockSpec((TM, C2), lambda i: (i, 0)),
            compiler_params=pltpu.CompilerParams(
                dimension_semantics=("parallel",),
                vmem_limit_bytes=_vmem_limit(est2)),
            input_output_aliases={0: 0},   # reuse y's HBM buffer for the output
        )(y2, scale2, shift2)
        out3 = out2.reshape(N, OHW, Cout)

    # [N, OH*OW, Cout] -> NCHW (single fused reshape/transpose pass).
    out = out3.reshape(N, OH, OW, Cout)
    out = jnp.transpose(out, (0, 3, 1, 2))
    return out.astype(x.dtype)


# ---------------------------------------------------------------------------
# Pure-JAX reference (same semantics) for a sanity check
# ---------------------------------------------------------------------------
def _reference(x, conv_w, gamma, beta, bn_act=True):
    y = lax.conv_general_dilated(
        x, conv_w, window_strides=(1, 1), padding=((1, 1), (1, 1)),
        rhs_dilation=(1, 1), dimension_numbers=("NCHW", "OIHW", "NCHW"))
    if not bn_act:
        return y
    m = y.mean(axis=(0, 2, 3), keepdims=True)
    v = y.var(axis=(0, 2, 3), keepdims=True)        # biased, like torch train BN
    yn = (y - m) / jnp.sqrt(v + _EPS)
    yn = yn * gamma.reshape(1, -1, 1, 1) + beta.reshape(1, -1, 1, 1)
    return jax.nn.gelu(yn, approximate=False)


if __name__ == "__main__":
    # Conv(nIn=4, nOut=8, kSize=3, stride=1, padding=1, bn_act=True, bias=False)
    key = jax.random.PRNGKey(0)
    k1, k2, k3, k4 = jax.random.split(key, 4)

    N, Cin, H, W = 2, 4, 16, 16
    Cout, ks = 8, 3

    x = jax.random.normal(k1, (N, Cin, H, W), jnp.float32)
    conv_w = jax.random.normal(k2, (Cout, Cin, ks, ks), jnp.float32) * 0.2
    gamma = 1.0 + 0.1 * jax.random.normal(k3, (Cout,), jnp.float32)
    beta = 0.1 * jax.random.normal(k4, (Cout,), jnp.float32)

    # Exact-f32 path vs. the PyTorch-semantics reference.
    out = conv_forward(x, conv_w, gamma, beta, stride=(1, 1), padding=(1, 1),
                       dilation=(1, 1), groups=1, bn_act=True, use_bf16=False)
    out = jax.block_until_ready(out)
    ref = _reference(x, conv_w, gamma, beta, bn_act=True)
    assert out.shape == (N, Cout, H, W), out.shape
    assert jnp.allclose(out, ref, rtol=1e-4, atol=1e-4), float(jnp.abs(out - ref).max())

    # Conv-only path (bn_act=False).
    out_c = conv_forward(x, conv_w, gamma, beta, stride=(1, 1), padding=(1, 1),
                         dilation=(1, 1), groups=1, bn_act=False, use_bf16=False)
    out_c = jax.block_until_ready(out_c)
    ref_c = _reference(x, conv_w, gamma, beta, bn_act=False)
    assert jnp.allclose(out_c, ref_c, rtol=1e-4, atol=1e-4), \
        float(jnp.abs(out_c - ref_c).max())

    # Default bf16-MXU path (intentionally not bit-exact; loose tolerance).
    out_b = conv_forward(x, conv_w, gamma, beta, stride=(1, 1), padding=(1, 1),
                         dilation=(1, 1), groups=1, bn_act=True, use_bf16=True)
    out_b = jax.block_until_ready(out_b)
    assert jnp.allclose(out_b, ref, rtol=1e-1, atol=1e-1), \
        float(jnp.abs(out_b - ref).max())

    print("KERNEL_OK")
</pallas_src>

<mosaic_0001>
module attributes {stable_mosaic.version = 11 : i64} {
  func.func @kernel(%arg0: i32, %arg1: memref<1x18x18x4xf32, #tpu.memory_space<vmem>>, %arg2: memref<36x128xf32, #tpu.memory_space<vmem>>, %arg3: memref<1x256x8xf32, #tpu.memory_space<vmem>>, %arg4: memref<1x1x128xf32, #tpu.memory_space<vmem>>, %arg5: memref<1x1x128xf32, #tpu.memory_space<vmem>>, %arg6: memref<16x16x36xf32, #tpu.memory_space<vmem>>) attributes {dimension_semantics = [#tpu.dimension_semantics<parallel>], iteration_bounds = array<i64: 2>, scalar_prefetch = 0 : i64, scratch_operands = 1 : i64, tpu.core_type = #tpu.core_type<tc>, window_params = [{transform_indices = @transform_0, window_bounds = array<i64: 1, 18, 18, 4>}, {pipeline_mode = #tpu.pipeline_mode<synchronous>, transform_indices = @transform_1, window_bounds = array<i64: 36, 128>}, {transform_indices = @transform_2, window_bounds = array<i64: 1, 256, 8>}, {transform_indices = @transform_3, window_bounds = array<i64: 1, 1, 128>}, {transform_indices = @transform_4, window_bounds = array<i64: 1, 1, 128>}]} {
    %c0 = arith.constant 0 : index
    %c0_0 = arith.constant 0 : index
    %c0_1 = arith.constant 0 : index
    %c0_2 = arith.constant 0 : index
    %0 = vector.load %arg1[%c0, %c0_0, %c0_1, %c0_2] : memref<1x18x18x4xf32, #tpu.memory_space<vmem>>, vector<1x16x16x4xf32>
    %1 = vector.shape_cast %0 : vector<1x16x16x4xf32> to vector<16x16x4xf32>
    %c0_3 = arith.constant 0 : index
    %c0_4 = arith.constant 0 : index
    %c0_5 = arith.constant 0 : index
    %2 = vector.load %arg6[%c0_3, %c0_4, %c0_5] : memref<16x16x36xf32, #tpu.memory_space<vmem>>, vector<16x16x4xf32>
    tpu.vector_store %arg6[%c0_3, %c0_4, %c0_5], %1 {strides = array<i32>} : memref<16x16x36xf32, #tpu.memory_space<vmem>>, vector<16x16x4xf32>,
    %c0_6 = arith.constant 0 : index
    %c0_7 = arith.constant 0 : index
    %c1 = arith.constant 1 : index
    %c0_8 = arith.constant 0 : index
    %3 = vector.load %arg1[%c0_6, %c0_7, %c1, %c0_8] : memref<1x18x18x4xf32, #tpu.memory_space<vmem>>, vector<1x16x16x4xf32>
    %4 = vector.shape_cast %3 : vector<1x16x16x4xf32> to vector<16x16x4xf32>
    %c0_9 = arith.constant 0 : index
    %c0_10 = arith.constant 0 : index
    %c4 = arith.constant 4 : index
    %5 = vector.load %arg6[%c0_9, %c0_10, %c4] : memref<16x16x36xf32, #tpu.memory_space<vmem>>, vector<16x16x4xf32>
    tpu.vector_store %arg6[%c0_9, %c0_10, %c4], %4 {strides = array<i32>} : memref<16x16x36xf32, #tpu.memory_space<vmem>>, vector<16x16x4xf32>,
    %c0_11 = arith.constant 0 : index
    %c0_12 = arith.constant 0 : index
    %c2 = arith.constant 2 : index
    %c0_13 = arith.constant 0 : index
    %6 = vector.load %arg1[%c0_11, %c0_12, %c2, %c0_13] : memref<1x18x18x4xf32, #tpu.memory_space<vmem>>, vector<1x16x16x4xf32>
    %7 = vector.shape_cast %6 : vector<1x16x16x4xf32> to vector<16x16x4xf32>
    %c0_14 = arith.constant 0 : index
    %c0_15 = arith.constant 0 : index
    %c8 = arith.constant 8 : index
    %8 = vector.load %arg6[%c0_14, %c0_15, %c8] : memref<16x16x36xf32, #tpu.memory_space<vmem>>, vector<16x16x4xf32>
    tpu.vector_store %arg6[%c0_14, %c0_15, %c8], %7 {strides = array<i32>} : memref<16x16x36xf32, #tpu.memory_space<vmem>>, vector<16x16x4xf32>,
    %c0_16 = arith.constant 0 : index
    %c1_17 = arith.constant 1 : index
    %c0_18 = arith.constant 0 : index
    %c0_19 = arith.constant 0 : index
    %9 = vector.load %arg1[%c0_16, %c1_17, %c0_18, %c0_19] : memref<1x18x18x4xf32, #tpu.memory_space<vmem>>, vector<1x16x16x4xf32>
    %10 = vector.shape_cast %9 : vector<1x16x16x4xf32> to vector<16x16x4xf32>
    %c0_20 = arith.constant 0 : index
    %c0_21 = arith.constant 0 : index
    %c12 = arith.constant 12 : index
    %11 = vector.load %arg6[%c0_20, %c0_21, %c12] : memref<16x16x36xf32, #tpu.memory_space<vmem>>, vector<16x16x4xf32>
    tpu.vector_store %arg6[%c0_20, %c0_21, %c12], %10 {strides = array<i32>} : memref<16x16x36xf32, #tpu.memory_space<vmem>>, vector<16x16x4xf32>,
    %c0_22 = arith.constant 0 : index
    %c1_23 = arith.constant 1 : index
    %c1_24 = arith.constant 1 : index
    %c0_25 = arith.constant 0 : index
    %12 = vector.load %arg1[%c0_22, %c1_23, %c1_24, %c0_25] : memref<1x18x18x4xf32, #tpu.memory_space<vmem>>, vector<1x16x16x4xf32>
    %13 = vector.shape_cast %12 : vector<1x16x16x4xf32> to vector<16x16x4xf32>
    %c0_26 = arith.constant 0 : index
    %c0_27 = arith.constant 0 : index
    %c16 = arith.constant 16 : index
    %14 = vector.load %arg6[%c0_26, %c0_27, %c16] : memref<16x16x36xf32, #tpu.memory_space<vmem>>, vector<16x16x4xf32>
    tpu.vector_store %arg6[%c0_26, %c0_27, %c16], %13 {strides = array<i32>} : memref<16x16x36xf32, #tpu.memory_space<vmem>>, vector<16x16x4xf32>,
    %c0_28 = arith.constant 0 : index
    %c1_29 = arith.constant 1 : index
    %c2_30 = arith.constant 2 : index
    %c0_31 = arith.constant 0 : index
    %15 = vector.load %arg1[%c0_28, %c1_29, %c2_30, %c0_31] : memref<1x18x18x4xf32, #tpu.memory_space<vmem>>, vector<1x16x16x4xf32>
    %16 = vector.shape_cast %15 : vector<1x16x16x4xf32> to vector<16x16x4xf32>
    %c0_32 = arith.constant 0 : index
    %c0_33 = arith.constant 0 : index
    %c20 = arith.constant 20 : index
    %17 = vector.load %arg6[%c0_32, %c0_33, %c20] : memref<16x16x36xf32, #tpu.memory_space<vmem>>, vector<16x16x4xf32>
    tpu.vector_store %arg6[%c0_32, %c0_33, %c20], %16 {strides = array<i32>} : memref<16x16x36xf32, #tpu.memory_space<vmem>>, vector<16x16x4xf32>,
    %c0_34 = arith.constant 0 : index
    %c2_35 = arith.constant 2 : index
    %c0_36 = arith.constant 0 : index
    %c0_37 = arith.constant 0 : index
    %18 = vector.load %arg1[%c0_34, %c2_35, %c0_36, %c0_37] : memref<1x18x18x4xf32, #tpu.memory_space<vmem>>, vector<1x16x16x4xf32>
    %19 = vector.shape_cast %18 : vector<1x16x16x4xf32> to vector<16x16x4xf32>
    %c0_38 = arith.constant 0 : index
    %c0_39 = arith.constant 0 : index
    %c24 = arith.constant 24 : index
    %20 = vector.load %arg6[%c0_38, %c0_39, %c24] : memref<16x16x36xf32, #tpu.memory_space<vmem>>, vector<16x16x4xf32>
    tpu.vector_store %arg6[%c0_38, %c0_39, %c24], %19 {strides = array<i32>} : memref<16x16x36xf32, #tpu.memory_space<vmem>>, vector<16x16x4xf32>,
    %c0_40 = arith.constant 0 : index
    %c2_41 = arith.constant 2 : index
    %c1_42 = arith.constant 1 : index
    %c0_43 = arith.constant 0 : index
    %21 = vector.load %arg1[%c0_40, %c2_41, %c1_42, %c0_43] : memref<1x18x18x4xf32, #tpu.memory_space<vmem>>, vector<1x16x16x4xf32>
    %22 = vector.shape_cast %21 : vector<1x16x16x4xf32> to vector<16x16x4xf32>
    %c0_44 = arith.constant 0 : index
    %c0_45 = arith.constant 0 : index
    %c28 = arith.constant 28 : index
    %23 = vector.load %arg6[%c0_44, %c0_45, %c28] : memref<16x16x36xf32, #tpu.memory_space<vmem>>, vector<16x16x4xf32>
    tpu.vector_store %arg6[%c0_44, %c0_45, %c28], %22 {strides = array<i32>} : memref<16x16x36xf32, #tpu.memory_space<vmem>>, vector<16x16x4xf32>,
    %c0_46 = arith.constant 0 : index
    %c2_47 = arith.constant 2 : index
    %c2_48 = arith.constant 2 : index
    %c0_49 = arith.constant 0 : index
    %24 = vector.load %arg1[%c0_46, %c2_47, %c2_48, %c0_49] : memref<1x18x18x4xf32, #tpu.memory_space<vmem>>, vector<1x16x16x4xf32>
    %25 = vector.shape_cast %24 : vector<1x16x16x4xf32> to vector<16x16x4xf32>
    %c0_50 = arith.constant 0 : index
    %c0_51 = arith.constant 0 : index
    %c32 = arith.constant 32 : index
    %26 = vector.load %arg6[%c0_50, %c0_51, %c32] : memref<16x16x36xf32, #tpu.memory_space<vmem>>, vector<16x16x4xf32>
    tpu.vector_store %arg6[%c0_50, %c0_51, %c32], %25 {strides = array<i32>} : memref<16x16x36xf32, #tpu.memory_space<vmem>>, vector<16x16x4xf32>,
    %c0_52 = arith.constant 0 : index
    %c0_53 = arith.constant 0 : index
    %c0_54 = arith.constant 0 : index
    %27 = vector.load %arg6[%c0_52, %c0_53, %c0_54] : memref<16x16x36xf32, #tpu.memory_space<vmem>>, vector<16x16x36xf32>
    %28 = vector.shape_cast %27 : vector<16x16x36xf32> to vector<256x36xf32>
    %c0_55 = arith.constant 0 : index
    %c0_56 = arith.constant 0 : index
    %29 = vector.load %arg2[%c0_55, %c0_56] : memref<36x128xf32, #tpu.memory_space<vmem>>, vector<36x128xf32>
    %cst = arith.constant dense<0.000000e+00> : vector<256x128xf32>
    %30 = tpu.matmul %28, %29, %cst {dimension_numbers = #tpu.dot_dimension_numbers<[1], [0], [0], [1], [0, 0, 1, 1], [], []>} : vector<256x36xf32>, vector<36x128xf32>, vector<256x128xf32> -> vector<256x128xf32>
    %31 = vector.extract_strided_slice %30 {offsets = [0, 0], sizes = [256, 8], strides = [1, 1]} : vector<256x128xf32> to vector<256x8xf32>
    %c0_57 = arith.constant 0 : index
    %c0_58 = arith.constant 0 : index
    %c0_59 = arith.constant 0 : index
    %32 = vector.load %arg3[%c0_57, %c0_58, %c0_59] : memref<1x256x8xf32, #tpu.memory_space<vmem>>, vector<1x256x8xf32>
    %33 = vector.shape_cast %32 : vector<1x256x8xf32> to vector<256x8xf32>
    %34 = vector.shape_cast %31 : vector<256x8xf32> to vector<1x256x8xf32>
    tpu.vector_store %arg3[%c0_57, %c0_58, %c0_59], %34 {strides = array<i32>} : memref<1x256x8xf32, #tpu.memory_space<vmem>>, vector<1x256x8xf32>,
    %cst_60 = arith.constant dense<0.000000e+00> : vector<128xf32>
    %35 = vector.multi_reduction <add>, %30, %cst_60 [0] : vector<256x128xf32> to vector<128xf32>
    %36 = vector.shape_cast %35 : vector<128xf32> to vector<1x128xf32>
    %c0_61 = arith.constant 0 : index
    %c0_62 = arith.constant 0 : index
    %c0_63 = arith.constant 0 : index
    %37 = vector.load %arg4[%c0_61, %c0_62, %c0_63] : memref<1x1x128xf32, #tpu.memory_space<vmem>>, vector<1x1x128xf32>
    %38 = vector.shape_cast %37 : vector<1x1x128xf32> to vector<1x128xf32>
    %39 = vector.shape_cast %36 : vector<1x128xf32> to vector<1x1x128xf32>
    tpu.vector_store %arg4[%c0_61, %c0_62, %c0_63], %39 {strides = array<i32>} : memref<1x1x128xf32, #tpu.memory_space<vmem>>, vector<1x1x128xf32>,
    %40 = arith.mulf %30, %30 : vector<256x128xf32>
    %cst_64 = arith.constant dense<0.000000e+00> : vector<128xf32>
    %41 = vector.multi_reduction <add>, %40, %cst_64 [0] : vector<256x128xf32> to vector<128xf32>
    %42 = vector.shape_cast %41 : vector<128xf32> to vector<1x128xf32>
    %c0_65 = arith.constant 0 : index
    %c0_66 = arith.constant 0 : index
    %c0_67 = arith.constant 0 : index
    %43 = vector.load %arg5[%c0_65, %c0_66, %c0_67] : memref<1x1x128xf32, #tpu.memory_space<vmem>>, vector<1x1x128xf32>
    %44 = vector.shape_cast %43 : vector<1x1x128xf32> to vector<1x128xf32>
    %45 = vector.shape_cast %42 : vector<1x128xf32> to vector<1x1x128xf32>
    tpu.vector_store %arg5[%c0_65, %c0_66, %c0_67], %45 {strides = array<i32>} : memref<1x1x128xf32, #tpu.memory_space<vmem>>, vector<1x1x128xf32>,
    return
  }
  func.func @transform_0(%arg0: i32) -> (i32, i32, i32, i32) {
    %c0_i32 = arith.constant 0 : i32
    %c0_i32_0 = arith.constant 0 : i32
    %c0_i32_1 = arith.constant 0 : i32
    %c0_i32_2 = arith.constant 0 : i32
    return %arg0, %c0_i32, %c0_i32_0, %c0_i32_1 : i32, i32, i32, i32
  }
  func.func @transform_1(%arg0: i32) -> (i32, i32) {
    %c0_i32 = arith.constant 0 : i32
    %c0_i32_0 = arith.constant 0 : i32
    %c0_i32_1 = arith.constant 0 : i32
    return %c0_i32, %c0_i32_0 : i32, i32
  }
  func.func @transform_2(%arg0: i32) -> (i32, i32, i32) {
    %c0_i32 = arith.constant 0 : i32
    %c0_i32_0 = arith.constant 0 : i32
    %c0_i32_1 = arith.constant 0 : i32
    return %arg0, %c0_i32, %c0_i32_0 : i32, i32, i32
  }
  func.func @transform_3(%arg0: i32) -> (i32, i32, i32) {
    %c0_i32 = arith.constant 0 : i32
    %c0_i32_0 = arith.constant 0 : i32
    %c0_i32_1 = arith.constant 0 : i32
    return %arg0, %c0_i32, %c0_i32_0 : i32, i32, i32
  }
  func.func @transform_4(%arg0: i32) -> (i32, i32, i32) {
    %c0_i32 = arith.constant 0 : i32
    %c0_i32_0 = arith.constant 0 : i32
    %c0_i32_1 = arith.constant 0 : i32
    return %arg0, %c0_i32, %c0_i32_0 : i32, i32, i32
  }
}

module attributes {stable_mosaic.version = 11 : i64} {
  func.func @_bn_gelu_kernel(%arg0: i32, %arg1: memref<32x128xf32, #tpu.memory_space<vmem>>, %arg2: memref<1x128xf32, #tpu.memory_space<vmem>>, %arg3: memref<1x128xf32, #tpu.memory_space<vmem>>, %arg4: memref<32x128xf32, #tpu.memory_space<vmem>>) attributes {dimension_semantics = [#tpu.dimension_semantics<parallel>], iteration_bounds = array<i64: 1>, scalar_prefetch = 0 : i64, scratch_operands = 0 : i64, tpu.core_type = #tpu.core_type<tc>, window_params = [{transform_indices = @transform_0, window_bounds = array<i64: 32, 128>}, {pipeline_mode = #tpu.pipeline_mode<synchronous>, transform_indices = @transform_1, window_bounds = array<i64: 1, 128>}, {pipeline_mode = #tpu.pipeline_mode<synchronous>, transform_indices = @transform_2, window_bounds = array<i64: 1, 128>}, {transform_indices = @transform_3, window_bounds = array<i64: 32, 128>}]} {
    %c0 = arith.constant 0 : index
    %c0_0 = arith.constant 0 : index
    %0 = vector.load %arg1[%c0, %c0_0] : memref<32x128xf32, #tpu.memory_space<vmem>>, vector<32x128xf32>
    %c0_1 = arith.constant 0 : index
    %c0_2 = arith.constant 0 : index
    %1 = vector.load %arg2[%c0_1, %c0_2] : memref<1x128xf32, #tpu.memory_space<vmem>>, vector<1x128xf32>
    %2 = vector.broadcast %1 : vector<1x128xf32> to vector<32x128xf32>
    %3 = arith.mulf %0, %2 : vector<32x128xf32>
    %c0_3 = arith.constant 0 : index
    %c0_4 = arith.constant 0 : index
    %4 = vector.load %arg3[%c0_3, %c0_4] : memref<1x128xf32, #tpu.memory_space<vmem>>, vector<1x128xf32>
    %5 = vector.broadcast %4 : vector<1x128xf32> to vector<32x128xf32>
    %6 = arith.addf %3, %5 : vector<32x128xf32>
    %cst = arith.constant 5.000000e-01 : f32
    %7 = vector.broadcast %cst : f32 to vector<32x128xf32>
    %8 = arith.mulf %6, %7 : vector<32x128xf32>
    %cst_5 = arith.constant 0.707106769 : f32
    %9 = vector.broadcast %cst_5 : f32 to vector<32x128xf32>
    %10 = arith.mulf %6, %9 : vector<32x128xf32>
    %11 = math.erf %10 : vector<32x128xf32>
    %cst_6 = arith.constant 1.000000e+00 : f32
    %12 = vector.broadcast %cst_6 : f32 to vector<32x128xf32>
    %13 = arith.addf %12, %11 : vector<32x128xf32>
    %14 = arith.mulf %8, %13 : vector<32x128xf32>
    %c0_7 = arith.constant 0 : index
    %c0_8 = arith.constant 0 : index
    %15 = vector.load %arg4[%c0_7, %c0_8] : memref<32x128xf32, #tpu.memory_space<vmem>>, vector<32x128xf32>
    tpu.vector_store %arg4[%c0_7, %c0_8], %14 {strides = array<i32>} : memref<32x128xf32, #tpu.memory_space<vmem>>, vector<32x128xf32>,
    return
  }
  func.func @transform_0(%arg0: i32) -> (i32, i32) {
    %c0_i32 = arith.constant 0 : i32
    %c0_i32_0 = arith.constant 0 : i32
    return %arg0, %c0_i32 : i32, i32
  }
  func.func @transform_1(%arg0: i32) -> (i32, i32) {
    %c0_i32 = arith.constant 0 : i32
    %c0_i32_0 = arith.constant 0 : i32
    %c0_i32_1 = arith.constant 0 : i32
    return %c0_i32, %c0_i32_0 : i32, i32
  }
  func.func @transform_2(%arg0: i32) -> (i32, i32) {
    %c0_i32 = arith.constant 0 : i32
    %c0_i32_0 = arith.constant 0 : i32
    %c0_i32_1 = arith.constant 0 : i32
    return %c0_i32, %c0_i32_0 : i32, i32
  }
  func.func @transform_3(%arg0: i32) -> (i32, i32) {
    %c0_i32 = arith.constant 0 : i32
    %c0_i32_0 = arith.constant 0 : i32
    return %arg0, %c0_i32 : i32, i32
  }
}

</mosaic_0001>

<bundles_post_ra>
// kernel: conv_forward.3
= control target key start
LH: loop header
LB: loop body
LE: loop exit
PB: predicated region body
PF: predicated region fallthrough
CT: control target
= control target key end

     0   :  { %s391_s0 = inlined_call_operand.vmem [shape: f32[32,128], index: 0, kind: input, shape index: {}, may-alias: {0,3}]   ;;  %s392_s1 = inlined_call_operand.vmem [shape: f32[1,128], index: 1, kind: input, shape index: {}]   ;;  %s393_s2 = inlined_call_operand.vmem [shape: f32[1,128], index: 2, kind: input, shape index: {}]   ;;  %s394_s3 = inlined_call_operand.vmem [shape: f32[32,128], index: 3, kind: output, shape index: {}, may-alias: {0,3}]  }
   0x1   :  { %v14_v0 = vld [vmem:[%s391_s0] sm:$0xff]  ;;  %v15_v3 = vld [vmem:[%s391_s0 + $0x8] sm:$0xff]  ;;  %v16_v6 = vld [vmem:[%s391_s0 + $0x10] sm:$0xff] }
   0x2   :  { %v222_v1 = vld [vmem:[%s392_s1] ss:$0 sm:$0xff]  ;;  %v17_v7 = vld [vmem:[%s391_s0 + $0x18] sm:$0xff] }
   0x3   :  { %v223_v2 = vld [vmem:[%s393_s2] ss:$0 sm:$0xff]  ;;  %v22_v4 = vmul.f32 %v222_v1, %v14_v0  ;;  %v23_v5 = vmul.f32 %v222_v1, %v15_v3  ;;  %v24_v8 = vmul.f32 %v222_v1, %v16_v6  ;;  %v25_v9 = vmul.f32 %v222_v1, %v17_v7 }
   0x5   :  { %v270_v10 = vadd.f32 %v223_v2, %v22_v4  ;;  %v272_v11 = vadd.f32 %v223_v2, %v23_v5  ;;  %v274_v12 = vadd.f32 %v223_v2, %v24_v8  ;;  %v276_v13 = vadd.f32 %v223_v2, %v25_v9 }
   0x7   :  { %v279_v14 = vmul.f32 0.70710677, %v270_v10  ;;  %v282_v15 = vmul.f32 0.70710677, %v272_v11  ;;  %v285_v16 = vmul.f32 0.70710677, %v274_v12 }
   0x8   :  { %v288_v17 = vmul.f32 0.70710677, %v276_v13 }
   0x9   :  { %v42_v18 = vmul.f32 %v279_v14, %v279_v14  ;;  %v82_v19 = vmul.f32 %v282_v15, %v282_v15  ;;  %v122_v20 = vmul.f32 %v285_v16, %v285_v16 }
   0xa   :  { %v162_v21 = vmul.f32 %v288_v17, %v288_v17 }
   0xb   :  { %v298_v22 = vmin.f32 %v42_v18, 16.0  ;;  %v300_v23 = vmin.f32 %v82_v19, 16.0  ;;  %v302_v24 = vmin.f32 %v122_v20, 16.0 }
   0xc   :  { %v304_v25 = vmin.f32 %v162_v21, 16.0 }
   0xd   :  { %v44_v26 = vmul.f32 2.1237322e-06, %v298_v22  ;;  %v55_v27 = vmul.f32 3.8918573e-05, %v298_v22  ;;  %v84_v28 = vmul.f32 2.1237322e-06, %v300_v23 }
   0xe   :  { %v95_v29 = vmul.f32 3.8918573e-05, %v300_v23  ;;  %v124_v30 = vmul.f32 2.1237322e-06, %v302_v24  ;;  %v135_v31 = vmul.f32 3.8918573e-05, %v302_v24 }
   0xf   :  { %v45_v32 = vadd.f32 0.00028619796, %v44_v26  ;;  %v56_v33 = vadd.f32 0.001143296, %v55_v27  ;;  %v85_v34 = vadd.f32 0.00028619796, %v84_v28 }
  0x10   :  { %v96_v35 = vadd.f32 0.001143296, %v95_v29  ;;  %v125_v36 = vadd.f32 0.00028619796, %v124_v30  ;;  %v136_v37 = vadd.f32 0.001143296, %v135_v31 }
  0x11   :  { %v46_v38 = vmul.f32 %v45_v32, %v298_v22  ;;  %v57_v39 = vmul.f32 %v56_v33, %v298_v22  ;;  %v86_v40 = vmul.f32 %v85_v34, %v300_v23  ;;  %v164_v41 = vmul.f32 2.1237322e-06, %v304_v25 }
  0x12   :  { %v97_v42 = vmul.f32 %v96_v35, %v300_v23  ;;  %v126_v43 = vmul.f32 %v125_v36, %v302_v24  ;;  %v137_v44 = vmul.f32 %v136_v37, %v302_v24  ;;  %v175_v58 = vmul.f32 3.8918573e-05, %v304_v25 }
  0x13   :  { %v47_v45 = vadd.f32 0.0036580483, %v46_v38  ;;  %v58_v46 = vadd.f32 0.014752088, %v57_v39  ;;  %v87_v47 = vadd.f32 0.0036580483, %v86_v40 }
  0x14   :  { %v98_v48 = vadd.f32 0.014752088, %v97_v42  ;;  %v127_v49 = vadd.f32 0.0036580483, %v126_v43  ;;  %v138_v50 = vadd.f32 0.014752088, %v137_v44 }
  0x15   :  { %v48_v51 = vmul.f32 %v47_v45, %v298_v22  ;;  %v59_v52 = vmul.f32 %v58_v46, %v298_v22  ;;  %v88_v53 = vmul.f32 %v87_v47, %v300_v23  ;;  %v165_v54 = vadd.f32 0.00028619796, %v164_v41 }
  0x16   :  { %v99_v55 = vmul.f32 %v98_v48, %v300_v23  ;;  %v128_v56 = vmul.f32 %v127_v49, %v302_v24  ;;  %v139_v57 = vmul.f32 %v138_v50, %v302_v24  ;;  %v176_v6 = vadd.f32 0.001143296, %v175_v58 }
  0x17   :  { %v49_v59 = vadd.f32 0.05243302, %v48_v51  ;;  %v60_v60 = vadd.f32 0.112945676, %v59_v52  ;;  %v89_v61 = vadd.f32 0.05243302, %v88_v53  ;;  %v166_v62 = vmul.f32 %v165_v54, %v304_v25 }
  0x18   :  { %v100_v63 = vadd.f32 0.112945676, %v99_v55  ;;  %v129_v0 = vadd.f32 0.05243302, %v128_v56  ;;  %v140_v3 = vadd.f32 0.112945676, %v139_v57  ;;  %v177_v29 = vmul.f32 %v176_v6, %v304_v25 }
  0x19   :  { %v50_v1 = vmul.f32 %v49_v59, %v298_v22  ;;  %v61_v2 = vmul.f32 %v60_v60, %v298_v22  ;;  %v90_v4 = vmul.f32 %v89_v61, %v300_v23  ;;  %v167_v18 = vadd.f32 0.0036580483, %v166_v62 }
  0x1a   :  { %v101_v5 = vmul.f32 %v100_v63, %v300_v23  ;;  %v130_v8 = vmul.f32 %v129_v0, %v302_v24  ;;  %v141_v9 = vmul.f32 %v140_v3, %v302_v24  ;;  %v178_v35 = vadd.f32 0.014752088, %v177_v29 }
  0x1b   :  { %v62_v7 = vadd.f32 0.4994258, %v61_v2  ;;  %v51_v20 = vadd.f32 0.18741608, %v50_v1  ;;  %v91_v27 = vadd.f32 0.18741608, %v90_v4  ;;  %v168_v32 = vmul.f32 %v167_v18, %v304_v25 }
  0x1c   :  { %v102_v19 = vadd.f32 0.4994258, %v101_v5  ;;  %v142_v26 = vadd.f32 0.4994258, %v141_v9  ;;  %v131_v31 = vadd.f32 0.18741608, %v130_v8  ;;  %v179_v41 = vmul.f32 %v178_v35, %v304_v25 }
  0x1d   :  { %v63_v21 = vmul.f32 %v62_v7, %v298_v22  ;;  %v52_v36 = vmul.f32 %v51_v20, %v298_v22  ;;  %v92_v37 = vmul.f32 %v91_v27, %v300_v23  ;;  %v169_v39 = vadd.f32 0.05243302, %v168_v32 }
  0x1e   :  { %v103_v28 = vmul.f32 %v102_v19, %v300_v23  ;;  %v143_v34 = vmul.f32 %v142_v26, %v302_v24  ;;  %v132_v38 = vmul.f32 %v131_v31, %v302_v24  ;;  %v180_v47 = vadd.f32 0.112945676, %v179_v41 }
  0x1f   :  { %v64_v30 = vadd.f32 1.0, %v63_v21  ;;  %v53_v42 = vadd.f32 1.1283791, %v52_v36  ;;  %v93_v43 = vadd.f32 1.1283791, %v92_v37  ;;  %v170_v46 = vmul.f32 %v169_v39, %v304_v25 }
  0x20   :  { %v104_v33 = vadd.f32 1.0, %v103_v28  ;;  %v144_v40 = vadd.f32 1.0, %v143_v34  ;;  %v133_v45 = vadd.f32 1.1283791, %v132_v38  ;;  %v181_v53 = vmul.f32 %v180_v47, %v304_v25 }
  0x21   :  { %224 = vrcp.f32 %v64_v30  ;;  %v74_v49 = vand.u32 2147483647, %v64_v30  ;;  %v76_v50 = vand.u32 2147483648, %v64_v30  ;;  %v54_v51 = vmul.f32 %v53_v42, %v279_v14 }
  0x22   :  { %226 = vrcp.f32 %v104_v33  ;;  %v114_v23 = vand.u32 2147483647, %v104_v33  ;;  %v116_v52 = vand.u32 2147483648, %v104_v33  ;;  %vm70_vm0 = vweird.f32 %v64_v30 }
  0x23   :  { %228 = vrcp.f32 %v144_v40  ;;  %v94_v55 = vmul.f32 %v93_v43, %v282_v15  ;;  %vm110_vm2 = vweird.f32 %v104_v33  ;;  %v182_v57 = vadd.f32 0.4994258, %v181_v53 }
  0x24   :  { %vm346_vm4 = vcmp.eq.f32.partialorder %v74_v49, 8.507059e+37  ;;  %v77_v14 = vor.u32 1.1754944e-38, %v76_v50  ;;  %vm350_vm5 = vcmp.eq.f32.partialorder %v114_v23, 8.507059e+37  ;;  %v117_v63 = vor.u32 1.1754944e-38, %v116_v52 }
  0x25   :  { %v183_v1 = vmul.f32 %v182_v57, %v304_v25  ;;  %vm150_vm8 = vweird.f32 %v144_v40  ;;  %v154_v4 = vand.u32 2147483647, %v144_v40  ;;  %v156_v5 = vand.u32 2147483648, %v144_v40 }
  0x26   :  { %v171_v18 = vadd.f32 0.18741608, %v170_v46  ;;  %v34_v32 = vmul.f32 0.5, %v270_v10  ;;  %v35_v34 = vmul.f32 0.5, %v272_v11  ;;  %v37_v53 = vmul.f32 0.5, %v276_v13 }
  0x27   :  { %v225_v44 = vpop.eup %224  ;;  %v184_v8 = vadd.f32 1.0, %v183_v1  ;;  %v157_v28 = vor.u32 1.1754944e-38, %v156_v5  ;;  %vm155_vm11 = vcmp.eq.f32.partialorder %v154_v4, 8.507059e+37 }
  0x28   :  { %v227_v48 = vpop.eup %226  ;;  %v66_v22 = vmul.f32 %v225_v44, %v64_v30  ;;  %vm71_vm1 = vweird.f32 %v225_v44  ;;  %v134_v30 = vmul.f32 %v133_v45, %v285_v16  ;;  %v172_v37 = vmul.f32 %v171_v18, %v304_v25 }
  0x29   :  { %v106_v24 = vmul.f32 %v227_v48, %v104_v33  ;;  %vm111_vm3 = vweird.f32 %v227_v48  ;;  %v229_v58 = vpop.eup %228  ;;  %vm354_vm6 = vmor %vm70_vm0, %vm71_vm1  ;;  %230 = vrcp.f32 %v184_v8  ;;  %v196_v10 = vand.u32 2147483648, %v184_v8 }
  0x2a   :  { %v67_v54 = vsub.f32 1.0, %v66_v22  ;;  %v146_v0 = vmul.f32 %v229_v58, %v144_v40  ;;  %vm359_vm7 = vmor %vm110_vm2, %vm111_vm3  ;;  %vm151_vm9 = vweird.f32 %v229_v58  ;;  %v173_v47 = vadd.f32 1.1283791, %v172_v37 }
  0x2b   :  { %v107_v56 = vsub.f32 1.0, %v106_v24  ;;  %vm152_vm10 = vmor %vm150_vm8, %vm151_vm9  ;;  %vm190_vm12 = vweird.f32 %v184_v8  ;;  %v194_v25 = vand.u32 2147483647, %v184_v8  ;;  %v197_v49 = vor.u32 1.1754944e-38, %v196_v10 }
  0x2c   :  { %v68_v59 = vmul.f32 %v225_v44, %v67_v54  ;;  %v147_v7 = vsub.f32 1.0, %v146_v0  ;;  %v174_v50 = vmul.f32 %v173_v47, %v288_v17 }
  0x2d   :  { %v108_v15 = vmul.f32 %v227_v48, %v107_v56  ;;  %vm195_vm15 = vcmp.eq.f32.partialorder %v194_v25, 8.507059e+37 }
  0x2e   :  { %v69_v2 = vadd.f32 %v225_v44, %v68_v59  ;;  %v148_v21 = vmul.f32 %v229_v58, %v147_v7 }
  0x2f   :  { %v109_v6 = vadd.f32 %v227_v48, %v108_v15  ;;  %v231_v41 = vpop.eup %230 }
  0x30   :  { %v73_v9 = vsel %vm354_vm6, %v225_v44, %v69_v2  ;;  %v149_v31 = vadd.f32 %v229_v58, %v148_v21  ;;  %v36_v44 = vmul.f32 0.5, %v274_v12  ;;  %v186_v16 = vmul.f32 %v231_v41, %v184_v8 }
  0x31   :  { %v78_v19 = vsel %vm346_vm4, %v77_v14, %v73_v9  ;;  %v113_v20 = vsel %vm359_vm7, %v227_v48, %v109_v6  ;;  %vm191_vm13 = vweird.f32 %v231_v41 }
  0x32   :  { %v79_v26 = vmul.f32 %v78_v19, %v54_v51  ;;  %v118_v27 = vsel %vm350_vm5, %v117_v63, %v113_v20  ;;  %v153_v36 = vsel %vm152_vm10, %v229_v58, %v149_v31  ;;  %v187_v11 = vsub.f32 1.0, %v186_v16  ;;  %vm192_vm14 = vmor %vm190_vm12, %vm191_vm13 }
  0x33   :  { %v119_v29 = vmul.f32 %v118_v27, %v94_v55  ;;  %v158_v39 = vsel %vm155_vm11, %v157_v28, %v153_v36 }
  0x34   :  { %v218_v33 = vclamps-f32 %v79_v26, 1.0  ;;  %v159_v42 = vmul.f32 %v158_v39, %v134_v30  ;;  %v188_v22 = vmul.f32 %v231_v41, %v187_v11 }
  0x35   :  { %v219_v35 = vclamps-f32 %v119_v29, 1.0 }
  0x36   :  { %v202_v38 = vadd.f32 1.0, %v218_v33  ;;  %v220_v46 = vclamps-f32 %v159_v42, 1.0  ;;  %v189_v23 = vadd.f32 %v231_v41, %v188_v22 }
  0x37   :  { %v203_v40 = vadd.f32 1.0, %v219_v35 }
  0x38   :  { %v206_v43 = vmul.f32 %v202_v38, %v34_v32  ;;  %v204_v48 = vadd.f32 1.0, %v220_v46  ;;  %v193_v51 = vsel %vm192_vm14, %v231_v41, %v189_v23 }
  0x39   :  { %v207_v45 = vmul.f32 %v203_v40, %v35_v34  ;;  %v198_v24 = vsel %vm195_vm15, %v197_v49, %v193_v51 }
  0x3a   :  { %210 = vst [vmem:[%s394_s3] sm:$0xff] %v206_v43  ;;  %v208_v12 = vmul.f32 %v204_v48, %v36_v44  ;;  %v199_v52 = vmul.f32 %v198_v24, %v174_v50 }
  0x3b   :  { %211 = vst [vmem:[%s394_s3 + $0x8] sm:$0xff] %v207_v45 }
  0x3c   :  { %212 = vst [vmem:[%s394_s3 + $0x10] sm:$0xff] %v208_v12  ;;  %v221_v54 = vclamps-f32 %v199_v52, 1.0 }
  0x3e   :  { %v205_v55 = vadd.f32 1.0, %v221_v54 }
  0x40   :  { %v209_v56 = vmul.f32 %v205_v55, %v37_v53 }
  0x42   :  { %213 = vst [vmem:[%s394_s3 + $0x18] sm:$0xff] %v209_v56 }

// kernel: conv_forward.2
= control target key start
LH: loop header
LB: loop body
LE: loop exit
PB: predicated region body
PF: predicated region fallthrough
CT: control target
= control target key end

     0   :  { %s2632_s15 = smov 0   ;;  %s3924_s0 = inlined_call_operand.vmem [shape: f32[2,18,18,4], index: 0, kind: input, shape index: {}]   ;;  %s3925_s1 = inlined_call_operand.vmem [shape: f32[36,128], index: 1, kind: input, shape index: {}]   ;;  %s3926_s2 = inlined_call_operand.vmem [shape: f32[2,256,8], index: 2, kind: output, shape index: {0}]   ;;  %s3927_s3 = inlined_call_operand.vmem [shape: f32[2,1,128], index: 3, kind: output, shape index: {1}]   ;;  %s3928_s4 = inlined_call_operand.vmem [shape: f32[2,1,128], index: 4, kind: output, shape index: {2}]  }
   0x1 LB: > { %s2323_s16 = sadd.s32 4294967295, %s2597_s15   ;;  %p2327_p0 = scmp.ge.s32.totalorder %s2597_s15, 1  ;;  %s2597_s15 = sphi %s2632_s15, %s15_s15  }
   0x2   : > { %p167_p1 = scmp.lt.s32.totalorder %s2597_s15, 3 }
   0x4   : > { %p168_p2 = pnand %p2327_p0, %p167_p1 }
   0x6   : > { %171 = sbr.rel (%p168_p2) target bundleno = 970 (0x3ca), region = 28 }
   0xb   : > { %p199_p3 = scmp.lt.s32.totalorder %s2323_s16, 1  ;;  %s2599_s21 = smov 4   ;;  %vm247_vm0 = vcmask 31744   ;;  %vm440_vm1 = vcmask 64544   ;;  %vm633_vm2 = vcmask 97344   ;;  %vm827_vm3 = vcmask 130144  }
   0xc   : > { %s2600_s22 = smov 8   ;;  %s2601_s23 = smov 12   ;;  %vm1020_vm4 = vcmask 162944   ;;  %vm1213_vm5 = vcmask 195744   ;;  %vm1407_vm6 = vcmask 228544   ;;  %vm1960_vm7 = vcmask 1043456  }
   0xd   : > { %s4020_s16 = smov (!%p199_p3, %s2323_s16), 1  ;;  %s2602_s24 = smov 16   ;;  %vm1600_vm8 = vcmask 261344   ;;  %vm1793_vm9 = vcmask 294144   ;;  %vm1863_vm10 = vcmask 293888   ;;  %vm2077_vm11 = vcmask 64512  }
   0xe   : > { %s2574_s17 = smul.u32 432, %s4020_s16  ;;  %s2603_s25 = smov 20  }
   0xf   : > { %s2604_s26 = smov 24   ;;  %s2605_s27 = smov 32  }
  0x10   : > { %s2646_s20 = scalar_lea.vmem %s3924_s0, %s2574_s17  ;;  %s2606_s28 = smov 28  }
  0x11   : > { %v2649_v0 = vld [vmem:[%s2646_s20 + $0x19] sm:$0xff]  ;;  %v280_v1 = vld [vmem:[%s2646_s20 + $0x1] sm:$0xff]  ;;  %v2656_v2 = vld [vmem:[%s2646_s20 + $0x31] sm:$0xff]  ;;  %s2558_s13 = sshll.u32 %s4020_s16, 8 }
  0x12   : > { %348 = vrot.lane.b32.xlu1 %v2649_v0, %s2599_s21  ;;  %344 = vrot.lane.b32.xlu0 %v280_v1, %s2599_s21  ;;  %v2661_v3 = vld [vmem:[%s2646_s20 + $0x21] sm:$0xff]  ;;  %v281_v4 = vld [vmem:[%s2646_s20 + $0x9] sm:$0xff]  ;;  %s3731_s18 = scalar_lea.vmem %s3926_s2, %s2558_s13 }
  0x13   : > { %352 = vrot.lane.b32.xlu2 %v2656_v2, %s2599_s21  ;;  %v2665_v5 = vld [vmem:[%s2646_s20 + $0x39] sm:$0xff]  ;;  %v2673_v6 = vld [vmem:[%s2646_s20 + $0x51] sm:$0xff]  ;;  %v2676_v7 = vld [vmem:[%s2646_s20 + $0x49] sm:$0xff] }
  0x14   : > { %v2679_v8 = vld [vmem:[%s2646_s20 + $0x61] sm:$0xff]  ;;  %v2688_v9 = vld [vmem:[%s2646_s20 + $0x79] sm:$0xff]  ;;  %v2691_v10 = vld [vmem:[%s2646_s20 + $0x69] sm:$0xff] }
  0x15   : > { %v2694_v11 = vld [vmem:[%s2646_s20 + $0x81] sm:$0xff]  ;;  %v2703_v12 = vld [vmem:[%s2646_s20 + $0x99] sm:$0xff]  ;;  %v2706_v13 = vld [vmem:[%s2646_s20 + $0x91] sm:$0xff] }
  0x16   : > { %v2709_v14 = vld [vmem:[%s2646_s20 + $0xa9] sm:$0xff]  ;;  %v2718_v15 = vld [vmem:[%s2646_s20 + $0xc1] sm:$0xff]  ;;  %v2721_v16 = vld [vmem:[%s2646_s20 + $0xb1] sm:$0xff] }
  0x17   : > { %v2724_v17 = vld [vmem:[%s2646_s20 + $0xc9] sm:$0xff]  ;;  %v2733_v18 = vld [vmem:[%s2646_s20 + $0xe1] sm:$0xff]  ;;  %v2736_v19 = vld [vmem:[%s2646_s20 + $0xd9] sm:$0xff] }
  0x18   : > { %v2739_v20 = vld [vmem:[%s2646_s20 + $0xf1] sm:$0xff]  ;;  %v2748_v21 = vld [vmem:[%s2646_s20 + $0x109] sm:$0xff]  ;;  %v2751_v22 = vld [vmem:[%s2646_s20 + $0xf9] sm:$0xff] }
  0x19   : > { %v2754_v23 = vld [vmem:[%s2646_s20 + $0x111] sm:$0xff]  ;;  %v2763_v24 = vld [vmem:[%s2646_s20 + $0x129] sm:$0xff]  ;;  %v2766_v25 = vld [vmem:[%s2646_s20 + $0x121] sm:$0xff] }
  0x1a   : > { %350 = vrot.lane.b32.xlu1 %v2661_v3, %s2599_s21  ;;  %346 = vrot.lane.b32.xlu0 %v281_v4, %s2599_s21  ;;  %v2769_v26 = vld [vmem:[%s2646_s20 + $0x139] sm:$0xff]  ;;  %v2778_v27 = vld [vmem:[%s2646_s20 + $0x151] sm:$0xff] }
  0x1b   : > { %354 = vrot.lane.b32.xlu2 %v2665_v5, %s2599_s21  ;;  %v2781_v28 = vld [vmem:[%s2646_s20 + $0x141] sm:$0xff]  ;;  %v2784_v29 = vld [vmem:[%s2646_s20 + $0x159] sm:$0xff]  ;;  %v2791_v30 = vld [vmem:[%s2646_s20 + $0x30] sm:$0xff] }
  0x1c   : > { %3959 = vst [vmem:[#allocation3_spill] sm:$0xff] %v2784_v29  ;;  %v2798_v31 = vld [vmem:[%s2646_s20 + $0x171] sm:$0xff]  ;;  %v2801_v32 = vld [vmem:[%s2646_s20 + $0x169] sm:$0xff]  ;;  %v215_v34 = vld [vmem:[%s2646_s20] sm:$0xff] }
  0x1d   : > { %252 = vst.msk [vmem:[#allocation2 + $0x20] sm:$0xff] %vm247_vm0, %v2791_v30  ;;  %v473_v33 = vld [vmem:[%s2646_s20 + $0x2] sm:$0xff]  ;;  %v2811_v35 = vld [vmem:[%s2646_s20 + $0x18] sm:$0xff]  ;;  %v474_v38 = vld [vmem:[%s2646_s20 + $0xa] sm:$0xff] }
  0x1e   : > { %3960 = vst [vmem:[#allocation4_spill] sm:$0xff] %v2798_v31  ;;  %v2817_v36 = vld [vmem:[%s2646_s20 + $0x38] sm:$0xff]  ;;  %v2826_v39 = vld [vmem:[%s2646_s20 + $0x22] sm:$0xff]  ;;  %v2853_v46 = vld [vmem:[%s2646_s20 + $0x4a] sm:$0xff] }
  0x1f   : > { %3961 = vst [vmem:[#allocation5_spill] sm:$0xff] %v2801_v32  ;;  %v2820_v37 = vld [vmem:[%s2646_s20 + $0x1a] sm:$0xff]  ;;  %v216_v41 = vld [vmem:[%s2646_s20 + $0x8] sm:$0xff]  ;;  %v2847_v45 = vld [vmem:[%s2646_s20 + $0x32] sm:$0xff] }
  0x20   : > { %248 = vst.msk [vmem:[#allocation2] sm:$0xff] %vm247_vm0, %v215_v34  ;;  %v2834_v40 = vld [vmem:[%s2646_s20 + $0x20] sm:$0xff]  ;;  %v2862_v47 = vld [vmem:[%s2646_s20 + $0x50] sm:$0xff]  ;;  %v2865_v48 = vld [vmem:[%s2646_s20 + $0x48] sm:$0xff] }
  0x21   : > { %250 = vst.msk [vmem:[#allocation2 + $0x10] sm:$0xff] %vm247_vm0, %v2811_v35  ;;  %v2841_v43 = vld [vmem:[%s2646_s20 + $0x60] sm:$0xff]  ;;  %v2878_v52 = vld [vmem:[%s2646_s20 + $0x52] sm:$0xff]  ;;  %v2884_v53 = vld [vmem:[%s2646_s20 + $0x6a] sm:$0xff] }
  0x22   : > { %358 = vrot.lane.b32.xlu1 %v2673_v6, %s2599_s21  ;;  %356 = vrot.lane.b32.xlu0 %v2676_v7, %s2599_s21  ;;  %3962 = vst [vmem:[#allocation6_spill] sm:$0xff] %v2820_v37  ;;  %v2844_v44 = vld [vmem:[%s2646_s20 + $0x3a] sm:$0xff]  ;;  %v2875_v51 = vld [vmem:[%s2646_s20 + $0x62] sm:$0xff] }
  0x23   : > { %360 = vrot.lane.b32.xlu2 %v2679_v8, %s2599_s21  ;;  %253 = vst.msk [vmem:[#allocation2 + $0x28] sm:$0xff] %vm247_vm0, %v2817_v36  ;;  %v2872_v50 = vld [vmem:[%s2646_s20 + $0x80] sm:$0xff]  ;;  %v2893_v54 = vld [vmem:[%s2646_s20 + $0x78] sm:$0xff]  ;;  %v2896_v55 = vld [vmem:[%s2646_s20 + $0x68] sm:$0xff] }
  0x24   : > { %3963 = vst [vmem:[#allocation7_spill] sm:$0xff] %v2826_v39  ;;  %v2903_v57 = vld [vmem:[%s2646_s20 + $0xa8] sm:$0xff]  ;;  %v2909_v59 = vld [vmem:[%s2646_s20 + $0x7a] sm:$0xff]  ;;  %v2915_v60 = vld [vmem:[%s2646_s20 + $0x92] sm:$0xff] }
  0x25   : > { %251 = vst.msk [vmem:[#allocation2 + $0x18] sm:$0xff] %vm247_vm0, %v2834_v40  ;;  %v2906_v58 = vld [vmem:[%s2646_s20 + $0x82] sm:$0xff]  ;;  %v2925_v63 = vld [vmem:[%s2646_s20 + $0x98] sm:$0xff]  ;;  %v2929_v4 = vld [vmem:[%s2646_s20 + $0x90] sm:$0xff] }
  0x26   : > { %249 = vst.msk [vmem:[#allocation2 + $0x8] sm:$0xff] %vm247_vm0, %v216_v41  ;;  %v2935_v34 = vld [vmem:[%s2646_s20 + $0x9a] sm:$0xff]  ;;  %v2944_v41 = vld [vmem:[%s2646_s20 + $0xb2] sm:$0xff] }
  0x27   : > { %3964 = vst [vmem:[#allocation8_spill] sm:$0xff] %v2844_v44 }
  0x28   : > { %3965 = vst [vmem:[#allocation9_spill] sm:$0xff] %v2847_v45 }
  0x29   : > { %256 = vst.msk [vmem:[#allocation2 + $0x40] sm:$0xff] %vm247_vm0, %v2841_v43 }
  0x2a   : > { %364 = vrot.lane.b32.xlu1 %v2688_v9, %s2599_s21  ;;  %362 = vrot.lane.b32.xlu0 %v2691_v10, %s2599_s21  ;;  %3966 = vst [vmem:[#allocation10_spill] sm:$0xff] %v2853_v46 }
  0x2b   : > { %366 = vrot.lane.b32.xlu2 %v2694_v11, %s2599_s21  ;;  %255 = vst.msk [vmem:[#allocation2 + $0x38] sm:$0xff] %vm247_vm0, %v2862_v47 }
  0x2c   : > { %254 = vst.msk [vmem:[#allocation2 + $0x30] sm:$0xff] %vm247_vm0, %v2865_v48 }
  0x2d   : > { %3967 = vst [vmem:[#allocation11_spill] sm:$0xff] %v2875_v51 }
  0x2e   : > { %3968 = vst [vmem:[#allocation12_spill] sm:$0xff] %v2878_v52 }
  0x2f   : > { %259 = vst.msk [vmem:[#allocation2 + $0x58] sm:$0xff] %vm247_vm0, %v2872_v50 }
  0x30   : > { %3969 = vst [vmem:[#allocation13_spill] sm:$0xff] %v2884_v53 }
  0x31   : > { %258 = vst.msk [vmem:[#allocation2 + $0x50] sm:$0xff] %vm247_vm0, %v2893_v54 }
  0x32   : > { %370 = vrot.lane.b32.xlu1 %v2703_v12, %s2599_s21  ;;  %368 = vrot.lane.b32.xlu0 %v2706_v13, %s2599_s21  ;;  %257 = vst.msk [vmem:[#allocation2 + $0x48] sm:$0xff] %vm247_vm0, %v2896_v55 }
  0x33   : > { %372 = vrot.lane.b32.xlu2 %v2709_v14, %s2599_s21  ;;  %3970 = vst [vmem:[#allocation14_spill] sm:$0xff] %v2906_v58 }
  0x34   : > { %3971 = vst [vmem:[#allocation15_spill] sm:$0xff] %v2909_v59 }
  0x35   : > { %262 = vst.msk [vmem:[#allocation2 + $0x70] sm:$0xff] %vm247_vm0, %v2903_v57 }
  0x36   : > { %3972 = vst [vmem:[#allocation16_spill] sm:$0xff] %v2915_v60 }
  0x37   : > { %3974 = vst [vmem:[#allocation18_spill] sm:$0xff] %v2935_v34 }
  0x38   : > { %261 = vst.msk [vmem:[#allocation2 + $0x68] sm:$0xff] %vm247_vm0, %v2925_v63 }
  0x39   : > { %3975 = vst [vmem:[#allocation19_spill] sm:$0xff] %v2944_v41 }
  0x3a   : > { %376 = vrot.lane.b32.xlu1 %v2718_v15, %s2599_s21  ;;  %374 = vrot.lane.b32.xlu0 %v2721_v16, %s2599_s21  ;;  %260 = vst.msk [vmem:[#allocation2 + $0x60] sm:$0xff] %vm247_vm0, %v2929_v4 }
  0x3b   : > { %378 = vrot.lane.b32.xlu2 %v2724_v17, %s2599_s21 }
  0x42   : > { %382 = vrot.lane.b32.xlu1 %v2733_v18, %s2599_s21  ;;  %380 = vrot.lane.b32.xlu0 %v2736_v19, %s2599_s21 }
  0x43   : > { %384 = vrot.lane.b32.xlu2 %v2739_v20, %s2599_s21 }
  0x4a   : > { %388 = vrot.lane.b32.xlu1 %v2748_v21, %s2599_s21  ;;  %386 = vrot.lane.b32.xlu0 %v2751_v22, %s2599_s21 }
  0x4b   : > { %390 = vrot.lane.b32.xlu2 %v2754_v23, %s2599_s21 }
  0x52   : > { %394 = vrot.lane.b32.xlu1 %v2763_v24, %s2599_s21  ;;  %392 = vrot.lane.b32.xlu0 %v2766_v25, %s2599_s21 }
  0x53   : > { %396 = vrot.lane.b32.xlu2 %v2769_v26, %s2599_s21 }
  0x5a   : > { %400 = vrot.lane.b32.xlu1 %v2778_v27, %s2599_s21  ;;  %398 = vrot.lane.b32.xlu0 %v2781_v28, %s2599_s21 }
  0x5b   : > { %402 = vrot.lane.b32.xlu2 %v2784_v29, %s2599_s21  ;;  %v3122_v29 = vld [vmem:[%s2646_s20 + $0x168] sm:$0xff] }
  0x5c   : > { %278 = vst.msk [vmem:[#allocation2 + $0xf0] sm:$0xff] %vm247_vm0, %v3122_v29 }
  0x62   : > { %406 = vrot.lane.b32.xlu1 %v2798_v31, %s2599_s21  ;;  %404 = vrot.lane.b32.xlu0 %v2801_v32, %s2599_s21  ;;  %v3125_v32 = vld [vmem:[%s2646_s20 + $0x172] sm:$0xff]  ;;  %s211_s21 = scalar_lea.vmem %s3927_s3, %s4020_s16 }
  0x63   : > { %537 = vrot.lane.b32.xlu2 %v473_v33, %s2600_s22  ;;  %v2932_v33 = vld [vmem:[%s2646_s20 + $0xaa] sm:$0xff] }
  0x64   : > { %3973 = vst [vmem:[#allocation17_spill] sm:$0xff] %v2932_v33 }
  0x6a   : > { %541 = vrot.lane.b32.xlu1 %v2820_v37, %s2600_s22  ;;  %539 = vrot.lane.b32.xlu0 %v474_v38, %s2600_s22  ;;  %v2939_v38 = vld [vmem:[%s2646_s20 + $0xc8] sm:$0xff]  ;;  %v3100_v37 = vld [vmem:[%s2646_s20 + $0x152] sm:$0xff] }
  0x6b   : > { %543 = vrot.lane.b32.xlu2 %v2826_v39, %s2600_s22  ;;  %265 = vst.msk [vmem:[#allocation2 + $0x88] sm:$0xff] %vm247_vm0, %v2939_v38  ;;  %v3071_v39 = vld [vmem:[%s2646_s20 + $0x158] sm:$0xff] }
  0x6c   : > { %277 = vst.msk [vmem:[#allocation2 + $0xe8] sm:$0xff] %vm247_vm0, %v3071_v39 }
  0x6d   : > { %v353_v42 = vpop.permute.xlu2 %352 }
  0x6e   : > { %445 = vst.msk [vmem:[#allocation2 + $0x20] sm:$0xff] %vm440_vm1, %v353_v42 }
  0x72   : > { %547 = vrot.lane.b32.xlu1 %v2844_v44, %s2600_s22  ;;  %545 = vrot.lane.b32.xlu0 %v2847_v45, %s2600_s22  ;;  %v3064_v44 = vld [vmem:[%s2646_s20 + $0x13a] sm:$0xff] }
  0x73   : > { %549 = vrot.lane.b32.xlu2 %v2853_v46, %s2600_s22  ;;  %v3038_v46 = vld [vmem:[%s2646_s20 + $0x138] sm:$0xff]  ;;  %3985 = vst [vmem:[#allocation29_spill] sm:$0xff] %v3064_v44 }
  0x74   : > { %274 = vst.msk [vmem:[#allocation2 + $0xd0] sm:$0xff] %vm247_vm0, %v3038_v46 }
  0x75   : > { %v355_v49 = vpop.permute.xlu2 %354 }
  0x76   : > { %446 = vst.msk [vmem:[#allocation2 + $0x28] sm:$0xff] %vm440_vm1, %v355_v49 }
  0x7a   : > { %553 = vrot.lane.b32.xlu1 %v2875_v51, %s2600_s22  ;;  %551 = vrot.lane.b32.xlu0 %v2878_v52, %s2600_s22  ;;  %v3031_v51 = vld [vmem:[%s2646_s20 + $0x112] sm:$0xff] }
  0x7b   : > { %555 = vrot.lane.b32.xlu2 %v2884_v53, %s2600_s22  ;;  %v3005_v53 = vld [vmem:[%s2646_s20 + $0x110] sm:$0xff]  ;;  %3982 = vst [vmem:[#allocation26_spill] sm:$0xff] %v3031_v51 }
  0x7c   : > { %271 = vst.msk [vmem:[#allocation2 + $0xb8] sm:$0xff] %vm247_vm0, %v3005_v53 }
  0x7d   : > { %v361_v56 = vpop.permute.xlu2 %360 }
  0x7e   : > { %449 = vst.msk [vmem:[#allocation2 + $0x40] sm:$0xff] %vm440_vm1, %v361_v56  ;;  %v2958_v56 = vld [vmem:[%s2646_s20 + $0xc0] sm:$0xff] }
  0x7f   : > { %264 = vst.msk [vmem:[#allocation2 + $0x80] sm:$0xff] %vm247_vm0, %v2958_v56 }
  0x82   : > { %559 = vrot.lane.b32.xlu1 %v2906_v58, %s2600_s22  ;;  %557 = vrot.lane.b32.xlu0 %v2909_v59, %s2600_s22  ;;  %v2998_v58 = vld [vmem:[%s2646_s20 + $0xf2] sm:$0xff] }
  0x83   : > { %561 = vrot.lane.b32.xlu2 %v2915_v60, %s2600_s22  ;;  %v2972_v60 = vld [vmem:[%s2646_s20 + $0xf0] sm:$0xff]  ;;  %3979 = vst [vmem:[#allocation23_spill] sm:$0xff] %v2998_v58 }
  0x84   : > { %v349_v61 = vpop.permute.xlu1 %348  ;;  %v345_v62 = vpop.permute.xlu0 %344  ;;  %268 = vst.msk [vmem:[#allocation2 + $0xa0] sm:$0xff] %vm247_vm0, %v2972_v60 }
  0x85   : > { %443 = vst.msk [vmem:[#allocation2 + $0x10] sm:$0xff] %vm440_vm1, %v349_v61  ;;  %v367_v1 = vpop.permute.xlu2 %366 }
  0x86   : > { %441 = vst.msk [vmem:[#allocation2] sm:$0xff] %vm440_vm1, %v345_v62  ;;  %v2962_v62 = vld [vmem:[%s2646_s20 + $0xb0] sm:$0xff] }
  0x87   : > { %452 = vst.msk [vmem:[#allocation2 + $0x58] sm:$0xff] %vm440_vm1, %v367_v1  ;;  %v2965_v1 = vld [vmem:[%s2646_s20 + $0xca] sm:$0xff] }
  0x88   : > { %3976 = vst [vmem:[#allocation20_spill] sm:$0xff] %v2965_v1 }
  0x89   : > { %263 = vst.msk [vmem:[#allocation2 + $0x78] sm:$0xff] %vm247_vm0, %v2962_v62 }
  0x8a   : > { %565 = vrot.lane.b32.xlu1 %v2932_v33, %s2600_s22  ;;  %563 = vrot.lane.b32.xlu0 %v2935_v34, %s2600_s22  ;;  %v2968_v33 = vld [vmem:[%s2646_s20 + $0xc2] sm:$0xff] }
  0x8b   : > { %567 = vrot.lane.b32.xlu2 %v2944_v41, %s2600_s22  ;;  %3977 = vst [vmem:[#allocation21_spill] sm:$0xff] %v2968_v33  ;;  %v2991_v41 = vld [vmem:[%s2646_s20 + $0xe0] sm:$0xff] }
  0x8c   : > { %v351_v42 = vpop.permute.xlu1 %350  ;;  %v347_v49 = vpop.permute.xlu0 %346  ;;  %267 = vst.msk [vmem:[#allocation2 + $0x98] sm:$0xff] %vm247_vm0, %v2991_v41 }
  0x8d   : > { %444 = vst.msk [vmem:[#allocation2 + $0x18] sm:$0xff] %vm440_vm1, %v351_v42  ;;  %v373_v61 = vpop.permute.xlu2 %372  ;;  %v2977_v42 = vld [vmem:[%s2646_s20 + $0xda] sm:$0xff] }
  0x8e   : > { %442 = vst.msk [vmem:[#allocation2 + $0x8] sm:$0xff] %vm440_vm1, %v347_v49 }
  0x8f   : > { %455 = vst.msk [vmem:[#allocation2 + $0x70] sm:$0xff] %vm440_vm1, %v373_v61 }
  0x90   : > { %3978 = vst [vmem:[#allocation22_spill] sm:$0xff] %v2977_v42 }
  0x92   : > { %571 = vrot.lane.b32.xlu1 %v2965_v1, %s2600_s22  ;;  %569 = vrot.lane.b32.xlu0 %v2968_v33, %s2600_s22  ;;  %v2995_v1 = vld [vmem:[%s2646_s20 + $0xd8] sm:$0xff]  ;;  %v3001_v33 = vld [vmem:[%s2646_s20 + $0xe2] sm:$0xff] }
  0x93   : > { %573 = vrot.lane.b32.xlu2 %v2977_v42, %s2600_s22  ;;  %3980 = vst [vmem:[#allocation24_spill] sm:$0xff] %v3001_v33  ;;  %v3024_v42 = vld [vmem:[%s2646_s20 + $0x108] sm:$0xff] }
  0x94   : > { %v359_v49 = vpop.permute.xlu1 %358  ;;  %v357_v61 = vpop.permute.xlu0 %356  ;;  %266 = vst.msk [vmem:[#allocation2 + $0x90] sm:$0xff] %vm247_vm0, %v2995_v1 }
  0x95   : > { %448 = vst.msk [vmem:[#allocation2 + $0x38] sm:$0xff] %vm440_vm1, %v359_v49  ;;  %v379_v34 = vpop.permute.xlu2 %378  ;;  %v3010_v49 = vld [vmem:[%s2646_s20 + $0xfa] sm:$0xff] }
  0x96   : > { %447 = vst.msk [vmem:[#allocation2 + $0x30] sm:$0xff] %vm440_vm1, %v357_v61 }
  0x97   : > { %458 = vst.msk [vmem:[#allocation2 + $0x88] sm:$0xff] %vm440_vm1, %v379_v34 }
  0x98   : > { %3981 = vst [vmem:[#allocation25_spill] sm:$0xff] %v3010_v49 }
  0x99   : > { %270 = vst.msk [vmem:[#allocation2 + $0xb0] sm:$0xff] %vm247_vm0, %v3024_v42 }
  0x9a   : > { %577 = vrot.lane.b32.xlu1 %v2998_v58, %s2600_s22  ;;  %575 = vrot.lane.b32.xlu0 %v3001_v33, %s2600_s22  ;;  %v3028_v58 = vld [vmem:[%s2646_s20 + $0xf8] sm:$0xff]  ;;  %v3034_v33 = vld [vmem:[%s2646_s20 + $0x10a] sm:$0xff] }
  0x9b   : > { %579 = vrot.lane.b32.xlu2 %v3010_v49, %s2600_s22  ;;  %3983 = vst [vmem:[#allocation27_spill] sm:$0xff] %v3034_v33  ;;  %v3057_v49 = vld [vmem:[%s2646_s20 + $0x128] sm:$0xff] }
  0x9c   : > { %v365_v34 = vpop.permute.xlu1 %364  ;;  %v363_v61 = vpop.permute.xlu0 %362  ;;  %269 = vst.msk [vmem:[#allocation2 + $0xa8] sm:$0xff] %vm247_vm0, %v3028_v58 }
  0x9d   : > { %451 = vst.msk [vmem:[#allocation2 + $0x50] sm:$0xff] %vm440_vm1, %v365_v34  ;;  %v385_v59 = vpop.permute.xlu2 %384  ;;  %v3043_v34 = vld [vmem:[%s2646_s20 + $0x122] sm:$0xff] }
  0x9e   : > { %450 = vst.msk [vmem:[#allocation2 + $0x48] sm:$0xff] %vm440_vm1, %v363_v61 }
  0x9f   : > { %461 = vst.msk [vmem:[#allocation2 + $0xa0] sm:$0xff] %vm440_vm1, %v385_v59 }
  0xa0   : > { %3984 = vst [vmem:[#allocation28_spill] sm:$0xff] %v3043_v34 }
  0xa1   : > { %273 = vst.msk [vmem:[#allocation2 + $0xc8] sm:$0xff] %vm247_vm0, %v3057_v49 }
  0xa2   : > { %583 = vrot.lane.b32.xlu1 %v3031_v51, %s2600_s22  ;;  %581 = vrot.lane.b32.xlu0 %v3034_v33, %s2600_s22  ;;  %v3061_v51 = vld [vmem:[%s2646_s20 + $0x120] sm:$0xff]  ;;  %v3067_v33 = vld [vmem:[%s2646_s20 + $0x12a] sm:$0xff] }
  0xa3   : > { %585 = vrot.lane.b32.xlu2 %v3043_v34, %s2600_s22  ;;  %3986 = vst [vmem:[#allocation30_spill] sm:$0xff] %v3067_v33  ;;  %v3090_v34 = vld [vmem:[%s2646_s20 + $0x150] sm:$0xff] }
  0xa4   : > { %v371_v59 = vpop.permute.xlu1 %370  ;;  %v369_v61 = vpop.permute.xlu0 %368  ;;  %272 = vst.msk [vmem:[#allocation2 + $0xc0] sm:$0xff] %vm247_vm0, %v3061_v51 }
  0xa5   : > { %454 = vst.msk [vmem:[#allocation2 + $0x68] sm:$0xff] %vm440_vm1, %v371_v59  ;;  %v391_v52 = vpop.permute.xlu2 %390  ;;  %v3076_v59 = vld [vmem:[%s2646_s20 + $0x142] sm:$0xff] }
  0xa6   : > { %453 = vst.msk [vmem:[#allocation2 + $0x60] sm:$0xff] %vm440_vm1, %v369_v61 }
  0xa7   : > { %464 = vst.msk [vmem:[#allocation2 + $0xb8] sm:$0xff] %vm440_vm1, %v391_v52 }
  0xa8   : > { %3987 = vst [vmem:[#allocation31_spill] sm:$0xff] %v3076_v59 }
  0xa9   : > { %276 = vst.msk [vmem:[#allocation2 + $0xe0] sm:$0xff] %vm247_vm0, %v3090_v34 }
  0xaa   : > { %589 = vrot.lane.b32.xlu1 %v3064_v44, %s2600_s22  ;;  %587 = vrot.lane.b32.xlu0 %v3067_v33, %s2600_s22  ;;  %v3094_v44 = vld [vmem:[%s2646_s20 + $0x140] sm:$0xff] }
  0xab   : > { %591 = vrot.lane.b32.xlu2 %v3076_v59, %s2600_s22  ;;  %v3097_v33 = vld [vmem:[%s2646_s20 + $0x15a] sm:$0xff]  ;;  %275 = vst.msk [vmem:[#allocation2 + $0xd8] sm:$0xff] %vm247_vm0, %v3094_v44 }
  0xac   : > { %v377_v52 = vpop.permute.xlu1 %376  ;;  %v375_v61 = vpop.permute.xlu0 %374 }
  0xad   : > { %457 = vst.msk [vmem:[#allocation2 + $0x80] sm:$0xff] %vm440_vm1, %v377_v52  ;;  %v397_v45 = vpop.permute.xlu2 %396  ;;  %v3106_v52 = vld [vmem:[%s2646_s20 + $0x16a] sm:$0xff] }
  0xae   : > { %456 = vst.msk [vmem:[#allocation2 + $0x78] sm:$0xff] %vm440_vm1, %v375_v61 }
  0xaf   : > { %467 = vst.msk [vmem:[#allocation2 + $0xd0] sm:$0xff] %vm440_vm1, %v397_v45  ;;  %v3118_v45 = vld [vmem:[%s2646_s20 + $0x170] sm:$0xff] }
  0xb0   : > { %3988 = vst [vmem:[#allocation32_spill] sm:$0xff] %v3106_v52 }
  0xb1   : > { %279 = vst.msk [vmem:[#allocation2 + $0xf8] sm:$0xff] %vm247_vm0, %v3118_v45 }
  0xb2   : > { %595 = vrot.lane.b32.xlu1 %v3097_v33, %s2600_s22  ;;  %593 = vrot.lane.b32.xlu0 %v3100_v37, %s2600_s22 }
  0xb3   : > { %597 = vrot.lane.b32.xlu2 %v3106_v52, %s2600_s22 }
  0xb4   : > { %v383_v61 = vpop.permute.xlu1 %382  ;;  %v381_v59 = vpop.permute.xlu0 %380 }
  0xb5   : > { %460 = vst.msk [vmem:[#allocation2 + $0x98] sm:$0xff] %vm440_vm1, %v383_v61  ;;  %v403_v31 = vpop.permute.xlu2 %402 }
  0xb6   : > { %459 = vst.msk [vmem:[#allocation2 + $0x90] sm:$0xff] %vm440_vm1, %v381_v59 }
  0xb7   : > { %470 = vst.msk [vmem:[#allocation2 + $0xe8] sm:$0xff] %vm440_vm1, %v403_v31 }
  0xba   : > { %731 = vrot.lane.b32.xlu1 %v2811_v35, %s2601_s23  ;;  %599 = vrot.lane.b32.xlu0 %v3125_v32, %s2600_s22 }
  0xbb   : > { %733 = vrot.lane.b32.xlu2 %v2834_v40, %s2601_s23 }
  0xbc   : > { %v389_v59 = vpop.permute.xlu1 %388  ;;  %v387_v61 = vpop.permute.xlu0 %386 }
  0xbd   : > { %463 = vst.msk [vmem:[#allocation2 + $0xb0] sm:$0xff] %vm440_vm1, %v389_v59  ;;  %v538_v31 = vpop.permute.xlu2 %537 }
  0xbe   : > { %462 = vst.msk [vmem:[#allocation2 + $0xa8] sm:$0xff] %vm440_vm1, %v387_v61 }
  0xbf   : > { %634 = vst.msk [vmem:[#allocation2] sm:$0xff] %vm633_vm2, %v538_v31 }
  0xc2   : > { %737 = vrot.lane.b32.xlu1 %v2817_v36, %s2601_s23  ;;  %735 = vrot.lane.b32.xlu0 %v2791_v30, %s2601_s23 }
  0xc3   : > { %739 = vrot.lane.b32.xlu2 %v2865_v48, %s2601_s23 }
  0xc4   : > { %v395_v35 = vpop.permute.xlu1 %394  ;;  %v393_v52 = vpop.permute.xlu0 %392 }
  0xc5   : > { %466 = vst.msk [vmem:[#allocation2 + $0xc8] sm:$0xff] %vm440_vm1, %v395_v35  ;;  %v544_v40 = vpop.permute.xlu2 %543  ;;  %v2361_v35 = vld [vmem:[%s2646_s20 + $0x180] sm:$0xff] }
  0xc6   : > { %465 = vst.msk [vmem:[#allocation2 + $0xc0] sm:$0xff] %vm440_vm1, %v393_v52 }
  0xc7   : > { %637 = vst.msk [vmem:[#allocation2 + $0x18] sm:$0xff] %vm633_vm2, %v544_v40  ;;  %v2362_v40 = vld [vmem:[%s2646_s20 + $0x188] sm:$0xff] }
  0xca   : > { %743 = vrot.lane.b32.xlu1 %v2841_v43, %s2601_s23  ;;  %741 = vrot.lane.b32.xlu0 %v2862_v47, %s2601_s23 }
  0xcb   : > { %745 = vrot.lane.b32.xlu2 %v2896_v55, %s2601_s23 }
  0xcc   : > { %v401_v36 = vpop.permute.xlu1 %400  ;;  %v399_v30 = vpop.permute.xlu0 %398 }
  0xcd   : > { %469 = vst.msk [vmem:[#allocation2 + $0xe0] sm:$0xff] %vm440_vm1, %v401_v36  ;;  %v550_v48 = vpop.permute.xlu2 %549 }
  0xce   : > { %468 = vst.msk [vmem:[#allocation2 + $0xd8] sm:$0xff] %vm440_vm1, %v399_v30 }
  0xcf   : > { %640 = vst.msk [vmem:[#allocation2 + $0x30] sm:$0xff] %vm633_vm2, %v550_v48 }
  0xd2   : > { %749 = vrot.lane.b32.xlu1 %v2872_v50, %s2601_s23  ;;  %747 = vrot.lane.b32.xlu0 %v2893_v54, %s2601_s23 }
  0xd3   : > { %751 = vrot.lane.b32.xlu2 %v2929_v4, %s2601_s23 }
  0xd4   : > { %v407_v43 = vpop.permute.xlu1 %406  ;;  %v405_v47 = vpop.permute.xlu0 %404 }
  0xd5   : > { %472 = vst.msk [vmem:[#allocation2 + $0xf8] sm:$0xff] %vm440_vm1, %v407_v43  ;;  %v556_v55 = vpop.permute.xlu2 %555  ;;  %v3989_v43 = vld [vmem:[#allocation5_spill] sm:$0xff] }
  0xd6   : > { %471 = vst.msk [vmem:[#allocation2 + $0xf0] sm:$0xff] %vm440_vm1, %v405_v47 }
  0xd7   : > { %643 = vst.msk [vmem:[#allocation2 + $0x48] sm:$0xff] %vm633_vm2, %v556_v55  ;;  %v3991_v55 = vld [vmem:[#allocation4_spill] sm:$0xff] }
  0xda   : > { %755 = vrot.lane.b32.xlu1 %v2903_v57, %s2601_s23  ;;  %753 = vrot.lane.b32.xlu0 %v2925_v63, %s2601_s23 }
  0xdb   : > { %757 = vrot.lane.b32.xlu2 %v2962_v62, %s2601_s23 }
  0xdc   : > { %v542_v50 = vpop.permute.xlu1 %541  ;;  %v540_v54 = vpop.permute.xlu0 %539 }
  0xdd   : > { %636 = vst.msk [vmem:[#allocation2 + $0x10] sm:$0xff] %vm633_vm2, %v542_v50  ;;  %v562_v52 = vpop.permute.xlu2 %561  ;;  %v2394_v50 = vld [vmem:[%s2646_s20 + $0x189] sm:$0xff] }
  0xde   : > { %635 = vst.msk [vmem:[#allocation2 + $0x8] sm:$0xff] %vm633_vm2, %v540_v54  ;;  %v2393_v54 = vld [vmem:[%s2646_s20 + $0x181] sm:$0xff] }
  0xdf   : > { %646 = vst.msk [vmem:[#allocation2 + $0x60] sm:$0xff] %vm633_vm2, %v562_v52 }
  0xe2   : > { %761 = vrot.lane.b32.xlu1 %v2939_v38, %s2601_s23  ;;  %759 = vrot.lane.b32.xlu0 %v2958_v56, %s2601_s23 }
  0xe3   : > { %763 = vrot.lane.b32.xlu2 %v2995_v1, %s2601_s23 }
  0xe4   : > { %v548_v57 = vpop.permute.xlu1 %547  ;;  %v546_v59 = vpop.permute.xlu0 %545 }
  0xe5   : > { %639 = vst.msk [vmem:[#allocation2 + $0x28] sm:$0xff] %vm633_vm2, %v548_v57  ;;  %v568_v62 = vpop.permute.xlu2 %567 }
  0xe6   : > { %638 = vst.msk [vmem:[#allocation2 + $0x20] sm:$0xff] %vm633_vm2, %v546_v59  ;;  %v3992_v59 = vld [vmem:[#allocation6_spill] sm:$0xff] }
  0xe7   : > { %649 = vst.msk [vmem:[#allocation2 + $0x78] sm:$0xff] %vm633_vm2, %v568_v62 }
  0xea   : > { %767 = vrot.lane.b32.xlu1 %v2972_v60, %s2601_s23  ;;  %765 = vrot.lane.b32.xlu0 %v2991_v41, %s2601_s23 }
  0xeb   : > { %769 = vrot.lane.b32.xlu2 %v3028_v58, %s2601_s23 }
  0xec   : > { %v554_v38 = vpop.permute.xlu1 %553  ;;  %v552_v56 = vpop.permute.xlu0 %551 }
  0xed   : > { %642 = vst.msk [vmem:[#allocation2 + $0x40] sm:$0xff] %vm633_vm2, %v554_v38  ;;  %v574_v1 = vpop.permute.xlu2 %573  ;;  %v3993_v38 = vld [vmem:[#allocation9_spill] sm:$0xff] }
  0xee   : > { %641 = vst.msk [vmem:[#allocation2 + $0x38] sm:$0xff] %vm633_vm2, %v552_v56  ;;  %v3994_v56 = vld [vmem:[#allocation7_spill] sm:$0xff] }
  0xef   : > { %652 = vst.msk [vmem:[#allocation2 + $0x90] sm:$0xff] %vm633_vm2, %v574_v1 }
  0xf2   : > { %773 = vrot.lane.b32.xlu1 %v3005_v53, %s2601_s23  ;;  %771 = vrot.lane.b32.xlu0 %v3024_v42, %s2601_s23 }
  0xf3   : > { %775 = vrot.lane.b32.xlu2 %v3061_v51, %s2601_s23 }
  0xf4   : > { %v560_v61 = vpop.permute.xlu1 %559  ;;  %v558_v41 = vpop.permute.xlu0 %557 }
  0xf5   : > { %645 = vst.msk [vmem:[#allocation2 + $0x58] sm:$0xff] %vm633_vm2, %v560_v61  ;;  %v580_v31 = vpop.permute.xlu2 %579 }
  0xf6   : > { %644 = vst.msk [vmem:[#allocation2 + $0x50] sm:$0xff] %vm633_vm2, %v558_v41  ;;  %v3995_v41 = vld [vmem:[#allocation8_spill] sm:$0xff] }
  0xf7   : > { %655 = vst.msk [vmem:[#allocation2 + $0xa8] sm:$0xff] %vm633_vm2, %v580_v31 }
  0xfa   : > { %779 = vrot.lane.b32.xlu1 %v3038_v46, %s2601_s23  ;;  %777 = vrot.lane.b32.xlu0 %v3057_v49, %s2601_s23 }
  0xfb   : > { %781 = vrot.lane.b32.xlu2 %v3094_v44, %s2601_s23 }
  0xfc   : > { %v566_v53 = vpop.permute.xlu1 %565  ;;  %v564_v42 = vpop.permute.xlu0 %563 }
  0xfd   : > { %648 = vst.msk [vmem:[#allocation2 + $0x70] sm:$0xff] %vm633_vm2, %v566_v53  ;;  %v586_v51 = vpop.permute.xlu2 %585  ;;  %v3996_v53 = vld [vmem:[#allocation12_spill] sm:$0xff] }
  0xfe   : > { %647 = vst.msk [vmem:[#allocation2 + $0x68] sm:$0xff] %vm633_vm2, %v564_v42  ;;  %v3997_v42 = vld [vmem:[#allocation10_spill] sm:$0xff] }
  0xff   : > { %658 = vst.msk [vmem:[#allocation2 + $0xc0] sm:$0xff] %vm633_vm2, %v586_v51 }
 0x102   : > { %785 = vrot.lane.b32.xlu1 %v3071_v39, %s2601_s23  ;;  %783 = vrot.lane.b32.xlu0 %v3090_v34, %s2601_s23 }
 0x103   : > { %787 = vrot.lane.b32.xlu2 %v3122_v29, %s2601_s23 }
 0x104   : > { %v572_v46 = vpop.permute.xlu1 %571  ;;  %v570_v49 = vpop.permute.xlu0 %569 }
 0x105   : > { %651 = vst.msk [vmem:[#allocation2 + $0x88] sm:$0xff] %vm633_vm2, %v572_v46  ;;  %v592_v44 = vpop.permute.xlu2 %591 }
 0x106   : > { %650 = vst.msk [vmem:[#allocation2 + $0x80] sm:$0xff] %vm633_vm2, %v570_v49  ;;  %v3998_v49 = vld [vmem:[#allocation11_spill] sm:$0xff] }
 0x107   : > { %661 = vst.msk [vmem:[#allocation2 + $0xd8] sm:$0xff] %vm633_vm2, %v592_v44 }
 0x10a   : > { %791 = vrot.lane.b32.xlu1 %v2361_v35, %s2601_s23  ;;  %789 = vrot.lane.b32.xlu0 %v3118_v45, %s2601_s23  ;;  %v3999_v35 = vld [vmem:[#allocation15_spill] sm:$0xff] }
 0x10b   : > { %793 = vrot.lane.b32.xlu2 %v2362_v40, %s2601_s23  ;;  %v4000_v40 = vld [vmem:[#allocation13_spill] sm:$0xff] }
 0x10c   : > { %v578_v39 = vpop.permute.xlu1 %577  ;;  %v576_v36 = vpop.permute.xlu0 %575 }
 0x10d   : > { %654 = vst.msk [vmem:[#allocation2 + $0xa0] sm:$0xff] %vm633_vm2, %v578_v39  ;;  %v598_v29 = vpop.permute.xlu2 %597 }
 0x10e   : > { %653 = vst.msk [vmem:[#allocation2 + $0x98] sm:$0xff] %vm633_vm2, %v576_v36 }
 0x10f   : > { %664 = vst.msk [vmem:[#allocation2 + $0xf0] sm:$0xff] %vm633_vm2, %v598_v29  ;;  %v4001_v29 = vld [vmem:[#allocation14_spill] sm:$0xff] }
 0x112   : > { %926 = vrot.lane.b32.xlu1 %v2661_v3, %s2602_s24  ;;  %924 = vrot.lane.b32.xlu0 %v2649_v0, %s2602_s24 }
 0x113   : > { %928 = vrot.lane.b32.xlu2 %v2656_v2, %s2602_s24 }
 0x114   : > { %v584_v30 = vpop.permute.xlu1 %583  ;;  %v582_v45 = vpop.permute.xlu0 %581 }
 0x115   : > { %657 = vst.msk [vmem:[#allocation2 + $0xb8] sm:$0xff] %vm633_vm2, %v584_v30  ;;  %v734_v48 = vpop.permute.xlu2 %733 }
 0x116   : > { %656 = vst.msk [vmem:[#allocation2 + $0xb0] sm:$0xff] %vm633_vm2, %v582_v45  ;;  %v4002_v45 = vld [vmem:[#allocation18_spill] sm:$0xff] }
 0x117   : > { %829 = vst.msk [vmem:[#allocation2 + $0x8] sm:$0xff] %vm827_vm3, %v734_v48  ;;  %v4003_v48 = vld [vmem:[#allocation16_spill] sm:$0xff] }
 0x11a   : > { %932 = vrot.lane.b32.xlu1 %v2676_v7, %s2602_s24  ;;  %930 = vrot.lane.b32.xlu0 %v2665_v5, %s2602_s24 }
 0x11b   : > { %934 = vrot.lane.b32.xlu2 %v2673_v6, %s2602_s24 }
 0x11c   : > { %v590_v0 = vpop.permute.xlu1 %589  ;;  %v588_v3 = vpop.permute.xlu0 %587 }
 0x11d   : > { %660 = vst.msk [vmem:[#allocation2 + $0xd0] sm:$0xff] %vm633_vm2, %v590_v0  ;;  %v740_v2 = vpop.permute.xlu2 %739 }
 0x11e   : > { %659 = vst.msk [vmem:[#allocation2 + $0xc8] sm:$0xff] %vm633_vm2, %v588_v3 }
 0x11f   : > { %832 = vst.msk [vmem:[#allocation2 + $0x20] sm:$0xff] %vm827_vm3, %v740_v2  ;;  %v4004_v2 = vld [vmem:[#allocation17_spill] sm:$0xff] }
 0x122   : > { %938 = vrot.lane.b32.xlu1 %v2691_v10, %s2602_s24  ;;  %936 = vrot.lane.b32.xlu0 %v2679_v8, %s2602_s24 }
 0x123   : > { %940 = vrot.lane.b32.xlu2 %v2688_v9, %s2602_s24 }
 0x124   : > { %v596_v7 = vpop.permute.xlu1 %595  ;;  %v594_v5 = vpop.permute.xlu0 %593 }
 0x125   : > { %663 = vst.msk [vmem:[#allocation2 + $0xe8] sm:$0xff] %vm633_vm2, %v596_v7  ;;  %v746_v6 = vpop.permute.xlu2 %745 }
 0x126   : > { %662 = vst.msk [vmem:[#allocation2 + $0xe0] sm:$0xff] %vm633_vm2, %v594_v5  ;;  %v4005_v5 = vld [vmem:[#allocation21_spill] sm:$0xff] }
 0x127   : > { %835 = vst.msk [vmem:[#allocation2 + $0x38] sm:$0xff] %vm827_vm3, %v746_v6  ;;  %v4006_v6 = vld [vmem:[#allocation19_spill] sm:$0xff] }
 0x12a   : > { %944 = vrot.lane.b32.xlu1 %v2706_v13, %s2602_s24  ;;  %942 = vrot.lane.b32.xlu0 %v2694_v11, %s2602_s24 }
 0x12b   : > { %946 = vrot.lane.b32.xlu2 %v2703_v12, %s2602_s24 }
 0x12c   : > { %v732_v10 = vpop.permute.xlu1 %731  ;;  %v600_v8 = vpop.permute.xlu0 %599 }
 0x12d   : > { %828 = vst.msk [vmem:[#allocation2] sm:$0xff] %vm827_vm3, %v732_v10  ;;  %v752_v9 = vpop.permute.xlu2 %751 }
 0x12e   : > { %665 = vst.msk [vmem:[#allocation2 + $0xf8] sm:$0xff] %vm633_vm2, %v600_v8 }
 0x12f   : > { %838 = vst.msk [vmem:[#allocation2 + $0x50] sm:$0xff] %vm827_vm3, %v752_v9  ;;  %v4007_v9 = vld [vmem:[#allocation20_spill] sm:$0xff] }
 0x132   : > { %950 = vrot.lane.b32.xlu1 %v2721_v16, %s2602_s24  ;;  %948 = vrot.lane.b32.xlu0 %v2709_v14, %s2602_s24 }
 0x133   : > { %952 = vrot.lane.b32.xlu2 %v2718_v15, %s2602_s24 }
 0x134   : > { %v738_v13 = vpop.permute.xlu1 %737  ;;  %v736_v11 = vpop.permute.xlu0 %735 }
 0x135   : > { %831 = vst.msk [vmem:[#allocation2 + $0x18] sm:$0xff] %vm827_vm3, %v738_v13  ;;  %v758_v12 = vpop.permute.xlu2 %757 }
 0x136   : > { %830 = vst.msk [vmem:[#allocation2 + $0x10] sm:$0xff] %vm827_vm3, %v736_v11  ;;  %v4008_v11 = vld [vmem:[#allocation24_spill] sm:$0xff] }
 0x137   : > { %841 = vst.msk [vmem:[#allocation2 + $0x68] sm:$0xff] %vm827_vm3, %v758_v12  ;;  %v4009_v12 = vld [vmem:[#allocation22_spill] sm:$0xff] }
 0x13a   : > { %956 = vrot.lane.b32.xlu1 %v2736_v19, %s2602_s24  ;;  %954 = vrot.lane.b32.xlu0 %v2724_v17, %s2602_s24 }
 0x13b   : > { %958 = vrot.lane.b32.xlu2 %v2733_v18, %s2602_s24 }
 0x13c   : > { %v744_v16 = vpop.permute.xlu1 %743  ;;  %v742_v14 = vpop.permute.xlu0 %741 }
 0x13d   : > { %834 = vst.msk [vmem:[#allocation2 + $0x30] sm:$0xff] %vm827_vm3, %v744_v16  ;;  %v764_v15 = vpop.permute.xlu2 %763 }
 0x13e   : > { %833 = vst.msk [vmem:[#allocation2 + $0x28] sm:$0xff] %vm827_vm3, %v742_v14 }
 0x13f   : > { %844 = vst.msk [vmem:[#allocation2 + $0x80] sm:$0xff] %vm827_vm3, %v764_v15  ;;  %v4010_v15 = vld [vmem:[#allocation23_spill] sm:$0xff] }
 0x142   : > { %962 = vrot.lane.b32.xlu1 %v2751_v22, %s2602_s24  ;;  %960 = vrot.lane.b32.xlu0 %v2739_v20, %s2602_s24 }
 0x143   : > { %964 = vrot.lane.b32.xlu2 %v2748_v21, %s2602_s24 }
 0x144   : > { %v750_v19 = vpop.permute.xlu1 %749  ;;  %v748_v17 = vpop.permute.xlu0 %747 }
 0x145   : > { %837 = vst.msk [vmem:[#allocation2 + $0x48] sm:$0xff] %vm827_vm3, %v750_v19  ;;  %v770_v18 = vpop.permute.xlu2 %769 }
 0x146   : > { %836 = vst.msk [vmem:[#allocation2 + $0x40] sm:$0xff] %vm827_vm3, %v748_v17  ;;  %v4011_v17 = vld [vmem:[#allocation27_spill] sm:$0xff] }
 0x147   : > { %847 = vst.msk [vmem:[#allocation2 + $0x98] sm:$0xff] %vm827_vm3, %v770_v18  ;;  %v4012_v18 = vld [vmem:[#allocation25_spill] sm:$0xff] }
 0x14a   : > { %968 = vrot.lane.b32.xlu1 %v2766_v25, %s2602_s24  ;;  %966 = vrot.lane.b32.xlu0 %v2754_v23, %s2602_s24 }
 0x14b   : > { %970 = vrot.lane.b32.xlu2 %v2763_v24, %s2602_s24 }
 0x14c   : > { %v756_v22 = vpop.permute.xlu1 %755  ;;  %v754_v20 = vpop.permute.xlu0 %753 }
 0x14d   : > { %840 = vst.msk [vmem:[#allocation2 + $0x60] sm:$0xff] %vm827_vm3, %v756_v22  ;;  %v776_v21 = vpop.permute.xlu2 %775 }
 0x14e   : > { %839 = vst.msk [vmem:[#allocation2 + $0x58] sm:$0xff] %vm827_vm3, %v754_v20 }
 0x14f   : > { %850 = vst.msk [vmem:[#allocation2 + $0xb0] sm:$0xff] %vm827_vm3, %v776_v21  ;;  %v4013_v21 = vld [vmem:[#allocation26_spill] sm:$0xff] }
 0x152   : > { %974 = vrot.lane.b32.xlu1 %v2781_v28, %s2602_s24  ;;  %972 = vrot.lane.b32.xlu0 %v2769_v26, %s2602_s24  ;;  %v3990_v28 = vld [vmem:[#allocation3_spill] sm:$0xff] }
 0x153   : > { %976 = vrot.lane.b32.xlu2 %v2778_v27, %s2602_s24 }
 0x154   : > { %v762_v23 = vpop.permute.xlu1 %761  ;;  %v760_v25 = vpop.permute.xlu0 %759 }
 0x155   : > { %843 = vst.msk [vmem:[#allocation2 + $0x78] sm:$0xff] %vm827_vm3, %v762_v23  ;;  %v782_v24 = vpop.permute.xlu2 %781 }
 0x156   : > { %842 = vst.msk [vmem:[#allocation2 + $0x70] sm:$0xff] %vm827_vm3, %v760_v25  ;;  %v4014_v25 = vld [vmem:[#allocation30_spill] sm:$0xff] }
 0x157   : > { %853 = vst.msk [vmem:[#allocation2 + $0xc8] sm:$0xff] %vm827_vm3, %v782_v24  ;;  %v4015_v24 = vld [vmem:[#allocation28_spill] sm:$0xff] }
 0x15a   : > { %980 = vrot.lane.b32.xlu1 %v3989_v43, %s2602_s24  ;;  %978 = vrot.lane.b32.xlu0 %v3990_v28, %s2602_s24 }
 0x15b   : > { %982 = vrot.lane.b32.xlu2 %v3991_v55, %s2602_s24  ;;  %v4017_v55 = vld [vmem:[#allocation31_spill] sm:$0xff] }
 0x15c   : > { %v768_v26 = vpop.permute.xlu1 %767  ;;  %v766_v47 = vpop.permute.xlu0 %765 }
 0x15d   : > { %846 = vst.msk [vmem:[#allocation2 + $0x90] sm:$0xff] %vm827_vm3, %v768_v26  ;;  %v788_v27 = vpop.permute.xlu2 %787  ;;  %v4016_v26 = vld [vmem:[#allocation29_spill] sm:$0xff] }
 0x15e   : > { %845 = vst.msk [vmem:[#allocation2 + $0x88] sm:$0xff] %vm827_vm3, %v766_v47 }
 0x15f   : > { %856 = vst.msk [vmem:[#allocation2 + $0xe0] sm:$0xff] %vm827_vm3, %v788_v27 }
 0x162   : > { %986 = vrot.lane.b32.xlu1 %v2394_v50, %s2602_s24  ;;  %984 = vrot.lane.b32.xlu0 %v2393_v54, %s2602_s24  ;;  %s214_s24 = scalar_lea.vmem %s3928_s4, %s4020_s16 }
 0x163   : > { %1117 = vrot.lane.b32.xlu2 %v3992_v59, %s2603_s25 }
 0x164   : > { %v774_v52 = vpop.permute.xlu1 %773  ;;  %v772_v57 = vpop.permute.xlu0 %771 }
 0x165   : > { %849 = vst.msk [vmem:[#allocation2 + $0xa8] sm:$0xff] %vm827_vm3, %v774_v52  ;;  %v794_v62 = vpop.permute.xlu2 %793  ;;  %v2427_v52 = vld [vmem:[%s2646_s20 + $0x30] sm:$0xff] }
 0x166   : > { %848 = vst.msk [vmem:[#allocation2 + $0xa0] sm:$0xff] %vm827_vm3, %v772_v57 }
 0x167   : > { %859 = vst.msk [vmem:[#allocation2 + $0xf8] sm:$0xff] %vm827_vm3, %v794_v62  ;;  %v2491_v62 = vld [vmem:[%s2646_s20 + $0x32] sm:$0xff] }
 0x16a   : > { %1121 = vrot.lane.b32.xlu1 %v3993_v38, %s2603_s25  ;;  %1119 = vrot.lane.b32.xlu0 %v3994_v56, %s2603_s25  ;;  %v2459_v38 = vld [vmem:[%s2646_s20 + $0x31] sm:$0xff] }
 0x16b   : > { %1123 = vrot.lane.b32.xlu2 %v3995_v41, %s2603_s25  ;;  %v2492_v41 = vld [vmem:[%s2646_s20 + $0x3a] sm:$0xff] }
 0x16c   : > { %v780_v1 = vpop.permute.xlu1 %779  ;;  %v778_v61 = vpop.permute.xlu0 %777 }
 0x16d   : > { %852 = vst.msk [vmem:[#allocation2 + $0xc0] sm:$0xff] %vm827_vm3, %v780_v1  ;;  %v929_v31 = vpop.permute.xlu2 %928 }
 0x16e   : > { %851 = vst.msk [vmem:[#allocation2 + $0xb8] sm:$0xff] %vm827_vm3, %v778_v61 }
 0x16f   : > { %1023 = vst.msk [vmem:[#allocation2 + $0x10] sm:$0xff] %vm1020_vm4, %v929_v31  ;;  %v2460_v31 = vld [vmem:[%s2646_s20 + $0x39] sm:$0xff] }
 0x172   : > { %1127 = vrot.lane.b32.xlu1 %v3996_v53, %s2603_s25  ;;  %1125 = vrot.lane.b32.xlu0 %v3997_v42, %s2603_s25  ;;  %v2429_v53 = vld [vmem:[%s2646_s20 + $0x48] sm:$0xff] }
 0x173   : > { %1129 = vrot.lane.b32.xlu2 %v3998_v49, %s2603_s25  ;;  %v2461_v49 = vld [vmem:[%s2646_s20 + $0x49] sm:$0xff] }
 0x174   : > { %v786_v51 = vpop.permute.xlu1 %785  ;;  %v784_v46 = vpop.permute.xlu0 %783 }
 0x175   : > { %855 = vst.msk [vmem:[#allocation2 + $0xd8] sm:$0xff] %vm827_vm3, %v786_v51  ;;  %v935_v44 = vpop.permute.xlu2 %934 }
 0x176   : > { %854 = vst.msk [vmem:[#allocation2 + $0xd0] sm:$0xff] %vm827_vm3, %v784_v46 }
 0x177   : > { %1026 = vst.msk [vmem:[#allocation2 + $0x28] sm:$0xff] %vm1020_vm4, %v935_v44  ;;  %v2467_v44 = vld [vmem:[%s2646_s20 + $0x91] sm:$0xff] }
 0x17a   : > { %1133 = vrot.lane.b32.xlu1 %v3999_v35, %s2603_s25  ;;  %1131 = vrot.lane.b32.xlu0 %v4000_v40, %s2603_s25 }
 0x17b   : > { %1135 = vrot.lane.b32.xlu2 %v4001_v29, %s2603_s25  ;;  %v2493_v29 = vld [vmem:[%s2646_s20 + $0x4a] sm:$0xff] }
 0x17c   : > { %v792_v39 = vpop.permute.xlu1 %791  ;;  %v790_v36 = vpop.permute.xlu0 %789 }
 0x17d   : > { %858 = vst.msk [vmem:[#allocation2 + $0xf0] sm:$0xff] %vm827_vm3, %v792_v39  ;;  %v941_v30 = vpop.permute.xlu2 %940 }
 0x17e   : > { %857 = vst.msk [vmem:[#allocation2 + $0xe8] sm:$0xff] %vm827_vm3, %v790_v36  ;;  %v2499_v36 = vld [vmem:[%s2646_s20 + $0x92] sm:$0xff] }
 0x17f   : > { %1029 = vst.msk [vmem:[#allocation2 + $0x40] sm:$0xff] %vm1020_vm4, %v941_v30  ;;  %v2430_v30 = vld [vmem:[%s2646_s20 + $0x50] sm:$0xff] }
 0x182   : > { %1139 = vrot.lane.b32.xlu1 %v4002_v45, %s2603_s25  ;;  %1137 = vrot.lane.b32.xlu0 %v4003_v48, %s2603_s25 }
 0x183   : > { %1141 = vrot.lane.b32.xlu2 %v4004_v2, %s2603_s25 }
 0x184   : > { %v927_v0 = vpop.permute.xlu1 %926  ;;  %v925_v3 = vpop.permute.xlu0 %924 }
 0x185   : > { %1022 = vst.msk [vmem:[#allocation2 + $0x8] sm:$0xff] %vm1020_vm4, %v927_v0  ;;  %v947_v7 = vpop.permute.xlu2 %946  ;;  %v2462_v0 = vld [vmem:[%s2646_s20 + $0x51] sm:$0xff] }
 0x186   : > { %1021 = vst.msk [vmem:[#allocation2] sm:$0xff] %vm1020_vm4, %v925_v3  ;;  %v2468_v3 = vld [vmem:[%s2646_s20 + $0x99] sm:$0xff] }
 0x187   : > { %1032 = vst.msk [vmem:[#allocation2 + $0x58] sm:$0xff] %vm1020_vm4, %v947_v7 }
 0x18a   : > { %1145 = vrot.lane.b32.xlu1 %v4005_v5, %s2603_s25  ;;  %1143 = vrot.lane.b32.xlu0 %v4006_v6, %s2603_s25  ;;  %v2494_v6 = vld [vmem:[%s2646_s20 + $0x52] sm:$0xff] }
 0x18b   : > { %1147 = vrot.lane.b32.xlu2 %v4007_v9, %s2603_s25 }
 0x18c   : > { %v933_v10 = vpop.permute.xlu1 %932  ;;  %v931_v8 = vpop.permute.xlu0 %930 }
 0x18d   : > { %1025 = vst.msk [vmem:[#allocation2 + $0x20] sm:$0xff] %vm1020_vm4, %v933_v10  ;;  %v953_v13 = vpop.permute.xlu2 %952  ;;  %v2500_v10 = vld [vmem:[%s2646_s20 + $0x9a] sm:$0xff] }
 0x18e   : > { %1024 = vst.msk [vmem:[#allocation2 + $0x18] sm:$0xff] %vm1020_vm4, %v931_v8 }
 0x18f   : > { %1035 = vst.msk [vmem:[#allocation2 + $0x70] sm:$0xff] %vm1020_vm4, %v953_v13  ;;  %v2507_v13 = vld [vmem:[%s2646_s20 + $0xf2] sm:$0xff] }
 0x192   : > { %1151 = vrot.lane.b32.xlu1 %v4008_v11, %s2603_s25  ;;  %1149 = vrot.lane.b32.xlu0 %v4009_v12, %s2603_s25  ;;  %v2475_v11 = vld [vmem:[%s2646_s20 + $0xf1] sm:$0xff]  ;;  %v2431_v12 = vld [vmem:[%s2646_s20 + $0x60] sm:$0xff] }
 0x193   : > { %1153 = vrot.lane.b32.xlu2 %v4010_v15, %s2603_s25  ;;  %v2463_v15 = vld [vmem:[%s2646_s20 + $0x61] sm:$0xff] }
 0x194   : > { %v939_v16 = vpop.permute.xlu1 %938  ;;  %v937_v14 = vpop.permute.xlu0 %936 }
 0x195   : > { %1028 = vst.msk [vmem:[#allocation2 + $0x38] sm:$0xff] %vm1020_vm4, %v939_v16  ;;  %v959_v19 = vpop.permute.xlu2 %958 }
 0x196   : > { %1027 = vst.msk [vmem:[#allocation2 + $0x30] sm:$0xff] %vm1020_vm4, %v937_v14 }
 0x197   : > { %1038 = vst.msk [vmem:[#allocation2 + $0x88] sm:$0xff] %vm1020_vm4, %v959_v19  ;;  %v2437_v19 = vld [vmem:[%s2646_s20 + $0xa8] sm:$0xff] }
 0x19a   : > { %1157 = vrot.lane.b32.xlu1 %v4011_v17, %s2603_s25  ;;  %1155 = vrot.lane.b32.xlu0 %v4012_v18, %s2603_s25  ;;  %v2469_v17 = vld [vmem:[%s2646_s20 + $0xa9] sm:$0xff] }
 0x19b   : > { %1159 = vrot.lane.b32.xlu2 %v4013_v21, %s2603_s25  ;;  %v2495_v21 = vld [vmem:[%s2646_s20 + $0x62] sm:$0xff] }
 0x19c   : > { %v945_v22 = vpop.permute.xlu1 %944  ;;  %v943_v20 = vpop.permute.xlu0 %942 }
 0x19d   : > { %1031 = vst.msk [vmem:[#allocation2 + $0x50] sm:$0xff] %vm1020_vm4, %v945_v22  ;;  %v965_v23 = vpop.permute.xlu2 %964 }
 0x19e   : > { %1030 = vst.msk [vmem:[#allocation2 + $0x48] sm:$0xff] %vm1020_vm4, %v943_v20 }
 0x19f   : > { %1041 = vst.msk [vmem:[#allocation2 + $0xa0] sm:$0xff] %vm1020_vm4, %v965_v23  ;;  %v2501_v23 = vld [vmem:[%s2646_s20 + $0xaa] sm:$0xff] }
 0x1a2   : > { %1163 = vrot.lane.b32.xlu1 %v4014_v25, %s2603_s25  ;;  %1161 = vrot.lane.b32.xlu0 %v4015_v24, %s2603_s25 }
 0x1a3   : > { %1165 = vrot.lane.b32.xlu2 %v4016_v26, %s2603_s25  ;;  %v2476_v26 = vld [vmem:[%s2646_s20 + $0xf9] sm:$0xff] }
 0x1a4   : > { %v951_v43 = vpop.permute.xlu1 %950  ;;  %v949_v28 = vpop.permute.xlu0 %948 }
 0x1a5   : > { %1034 = vst.msk [vmem:[#allocation2 + $0x68] sm:$0xff] %vm1020_vm4, %v951_v43  ;;  %v971_v47 = vpop.permute.xlu2 %970 }
 0x1a6   : > { %1033 = vst.msk [vmem:[#allocation2 + $0x60] sm:$0xff] %vm1020_vm4, %v949_v28  ;;  %v2508_v28 = vld [vmem:[%s2646_s20 + $0xfa] sm:$0xff] }
 0x1a7   : > { %1044 = vst.msk [vmem:[#allocation2 + $0xb8] sm:$0xff] %vm1020_vm4, %v971_v47  ;;  %v2432_v47 = vld [vmem:[%s2646_s20 + $0x68] sm:$0xff] }
 0x1aa   : > { %1169 = vrot.lane.b32.xlu1 %v3100_v37, %s2603_s25  ;;  %1167 = vrot.lane.b32.xlu0 %v4017_v55, %s2603_s25  ;;  %v4018_v37 = vld [vmem:[#allocation32_spill] sm:$0xff] }
 0x1ab   : > { %1171 = vrot.lane.b32.xlu2 %v3097_v33, %s2603_s25 }
 0x1ac   : > { %v957_v27 = vpop.permute.xlu1 %956  ;;  %v955_v50 = vpop.permute.xlu0 %954 }
 0x1ad   : > { %1037 = vst.msk [vmem:[#allocation2 + $0x80] sm:$0xff] %vm1020_vm4, %v957_v27  ;;  %v977_v54 = vpop.permute.xlu2 %976 }
 0x1ae   : > { %1036 = vst.msk [vmem:[#allocation2 + $0x78] sm:$0xff] %vm1020_vm4, %v955_v50  ;;  %v2464_v50 = vld [vmem:[%s2646_s20 + $0x69] sm:$0xff] }
 0x1af   : > { %1047 = vst.msk [vmem:[#allocation2 + $0xd0] sm:$0xff] %vm1020_vm4, %v977_v54  ;;  %v2438_v54 = vld [vmem:[%s2646_s20 + $0xb0] sm:$0xff] }
 0x1b2   : > { %1175 = vrot.lane.b32.xlu1 %v3125_v32, %s2603_s25  ;;  %1173 = vrot.lane.b32.xlu0 %v4018_v37, %s2603_s25  ;;  %v2428_v32 = vld [vmem:[%s2646_s20 + $0x38] sm:$0xff] }
 0x1b3   : > { %1311 = vrot.lane.b32.xlu2 %v2427_v52, %s2604_s26  ;;  %v2470_v52 = vld [vmem:[%s2646_s20 + $0xb1] sm:$0xff] }
 0x1b4   : > { %v963_v57 = vpop.permute.xlu1 %962  ;;  %v961_v59 = vpop.permute.xlu0 %960 }
 0x1b5   : > { %1040 = vst.msk [vmem:[#allocation2 + $0x98] sm:$0xff] %vm1020_vm4, %v963_v57  ;;  %v983_v33 = vpop.permute.xlu2 %982 }
 0x1b6   : > { %1039 = vst.msk [vmem:[#allocation2 + $0x90] sm:$0xff] %vm1020_vm4, %v961_v59  ;;  %v1862_v59 = vld [vmem:[%s3925_s1 + $0x20] sm:$0xf] }
 0x1b7   : > { %1050 = vst.msk [vmem:[#allocation2 + $0xe8] sm:$0xff] %vm1020_vm4, %v983_v33  ;;  %2523 = vmatpush.msk.msra.mxu0 %vm1960_vm7, %v1862_v59  ;;  %2559 = vmatpush.msk.msra.mxu1 %vm1960_vm7, %v1862_v59 }
 0x1b8   : > { %2560 = vmatpush.msk.msra.mxu2 %vm1960_vm7, %v1862_v59  ;;  %2561 = vmatpush.msk.msra.mxu3 %vm1960_vm7, %v1862_v59  ;;  %v2479_v59 = vld [vmem:[%s2646_s20 + $0x121] sm:$0xff] }
 0x1ba   : > { %1697 = vrot.lane.b32.xlu1 %v2491_v62, %s2605_s27  ;;  %1504 = vrot.lane.b32.xlu0 %v2459_v38, %s2606_s28  ;;  %v1861_v62 = vld [vmem:[%s3925_s1 + $0x18] sm:$0xff]  ;;  %v2445_v38 = vld [vmem:[%s2646_s20 + $0x108] sm:$0xff] }
 0x1bb   : > { %1313 = vrot.lane.b32.xlu2 %v2428_v32, %s2604_s26  ;;  %1976 = vmatpush.msra.mxu0 %v1861_v62  ;;  %v1860_v32 = vld [vmem:[%s3925_s1 + $0x10] sm:$0xff] }
 0x1bc   : > { %v969_v56 = vpop.permute.xlu1 %968  ;;  %v967_v1 = vpop.permute.xlu0 %966  ;;  %2562 = vmatpush.msra.mxu1 %v1861_v62  ;;  %2563 = vmatpush.msra.mxu2 %v1861_v62 }
 0x1bd   : > { %1043 = vst.msk [vmem:[#allocation2 + $0xb0] sm:$0xff] %vm1020_vm4, %v969_v56  ;;  %v1118_v61 = vpop.permute.xlu2 %1117  ;;  %v2496_v56 = vld [vmem:[%s2646_s20 + $0x6a] sm:$0xff]  ;;  %2564 = vmatpush.msra.mxu3 %v1861_v62  ;;  %1977 = vmatpush.msra.mxu0 %v1860_v32 }
 0x1be   : > { %1042 = vst.msk [vmem:[#allocation2 + $0xa8] sm:$0xff] %vm1020_vm4, %v967_v1  ;;  %v1859_v1 = vld [vmem:[%s3925_s1 + $0x8] sm:$0xff]  ;;  %2565 = vmatpush.msra.mxu1 %v1860_v32  ;;  %2566 = vmatpush.msra.mxu2 %v1860_v32 }
 0x1bf   : > { %1214 = vst.msk [vmem:[#allocation2] sm:$0xff] %vm1213_vm5, %v1118_v61  ;;  %1978 = vmatpush.msra.mxu0 %v1859_v1  ;;  %2567 = vmatpush.msra.mxu3 %v1860_v32  ;;  %v2485_v62 = vld [vmem:[%s2646_s20 + $0x169] sm:$0xff] }
 0x1c0   : > { %2568 = vmatpush.msra.mxu1 %v1859_v1  ;;  %2569 = vmatpush.msra.mxu2 %v1859_v1 }
 0x1c1   : > { %2570 = vmatpush.msra.mxu3 %v1859_v1 }
 0x1c2   : > { %1699 = vrot.lane.b32.xlu1 %v2492_v41, %s2605_s27  ;;  %1506 = vrot.lane.b32.xlu0 %v2460_v31, %s2606_s28 }
 0x1c3   : > { %1315 = vrot.lane.b32.xlu2 %v2429_v53, %s2604_s26  ;;  %v2477_v53 = vld [vmem:[%s2646_s20 + $0x109] sm:$0xff] }
 0x1c4   : > { %v975_v42 = vpop.permute.xlu1 %974  ;;  %v973_v51 = vpop.permute.xlu0 %972 }
 0x1c5   : > { %1046 = vst.msk [vmem:[#allocation2 + $0xc8] sm:$0xff] %vm1020_vm4, %v975_v42  ;;  %v1124_v46 = vpop.permute.xlu2 %1123  ;;  %v2502_v42 = vld [vmem:[%s2646_s20 + $0xb2] sm:$0xff] }
 0x1c6   : > { %1045 = vst.msk [vmem:[#allocation2 + $0xc0] sm:$0xff] %vm1020_vm4, %v973_v51  ;;  %v2483_v51 = vld [vmem:[%s2646_s20 + $0x151] sm:$0xff] }
 0x1c7   : > { %1217 = vst.msk [vmem:[#allocation2 + $0x18] sm:$0xff] %vm1213_vm5, %v1124_v46 }
 0x1ca   : > { %1508 = vrot.lane.b32.xlu1 %v2461_v49, %s2606_s28  ;;  %1327 = vrot.lane.b32.xlu0 %v2929_v4, %s2604_s26 }
 0x1cb   : > { %1520 = vrot.lane.b32.xlu2 %v2467_v44, %s2606_s28 }
 0x1cc   : > { %v981_v35 = vpop.permute.xlu1 %980  ;;  %v979_v40 = vpop.permute.xlu0 %978 }
 0x1cd   : > { %1049 = vst.msk [vmem:[#allocation2 + $0xe0] sm:$0xff] %vm1020_vm4, %v981_v35  ;;  %v1130_v39 = vpop.permute.xlu2 %1129  ;;  %v2515_v35 = vld [vmem:[%s2646_s20 + $0x152] sm:$0xff] }
 0x1ce   : > { %1048 = vst.msk [vmem:[#allocation2 + $0xd8] sm:$0xff] %vm1020_vm4, %v979_v40  ;;  %v2509_v40 = vld [vmem:[%s2646_s20 + $0x10a] sm:$0xff] }
 0x1cf   : > { %1220 = vst.msk [vmem:[#allocation2 + $0x30] sm:$0xff] %vm1213_vm5, %v1130_v39  ;;  %v2433_v39 = vld [vmem:[%s2646_s20 + $0x78] sm:$0xff] }
 0x1d2   : > { %1713 = vrot.lane.b32.xlu1 %v2499_v36, %s2605_s27  ;;  %1701 = vrot.lane.b32.xlu0 %v2493_v29, %s2605_s27 }
 0x1d3   : > { %1317 = vrot.lane.b32.xlu2 %v2430_v30, %s2604_s26 }
 0x1d4   : > { %v987_v4 = vpop.permute.xlu1 %986  ;;  %v985_v45 = vpop.permute.xlu0 %984 }
 0x1d5   : > { %1052 = vst.msk [vmem:[#allocation2 + $0xf8] sm:$0xff] %vm1020_vm4, %v987_v4  ;;  %v1136_v48 = vpop.permute.xlu2 %1135  ;;  %v2465_v4 = vld [vmem:[%s2646_s20 + $0x79] sm:$0xff] }
 0x1d6   : > { %1051 = vst.msk [vmem:[#allocation2 + $0xf0] sm:$0xff] %vm1020_vm4, %v985_v45  ;;  %v2439_v45 = vld [vmem:[%s2646_s20 + $0xc0] sm:$0xff] }
 0x1d7   : > { %1223 = vst.msk [vmem:[#allocation2 + $0x48] sm:$0xff] %vm1213_vm5, %v1136_v48  ;;  %v2471_v48 = vld [vmem:[%s2646_s20 + $0xc1] sm:$0xff] }
 0x1da   : > { %1510 = vrot.lane.b32.xlu1 %v2462_v0, %s2606_s28  ;;  %1329 = vrot.lane.b32.xlu0 %v2925_v63, %s2604_s26 }
 0x1db   : > { %1522 = vrot.lane.b32.xlu2 %v2468_v3, %s2606_s28 }
 0x1dc   : > { %v1122_v2 = vpop.permute.xlu1 %1121  ;;  %v1120_v7 = vpop.permute.xlu0 %1119 }
 0x1dd   : > { %1216 = vst.msk [vmem:[#allocation2 + $0x10] sm:$0xff] %vm1213_vm5, %v1122_v2  ;;  %v1142_v5 = vpop.permute.xlu2 %1141 }
 0x1de   : > { %1215 = vst.msk [vmem:[#allocation2 + $0x8] sm:$0xff] %vm1213_vm5, %v1120_v7  ;;  %v2452_v7 = vld [vmem:[%s2646_s20 + $0x158] sm:$0xff] }
 0x1df   : > { %1226 = vst.msk [vmem:[#allocation2 + $0x60] sm:$0xff] %vm1213_vm5, %v1142_v5  ;;  %v2446_v5 = vld [vmem:[%s2646_s20 + $0x110] sm:$0xff] }
 0x1e2   : > { %1703 = vrot.lane.b32.xlu1 %v2494_v6, %s2605_s27  ;;  %1343 = vrot.lane.b32.xlu0 %v2972_v60, %s2604_s26  ;;  %v2497_v6 = vld [vmem:[%s2646_s20 + $0x7a] sm:$0xff] }
 0x1e3   : > { %1715 = vrot.lane.b32.xlu2 %v2500_v10, %s2605_s27 }
 0x1e4   : > { %v1128_v63 = vpop.permute.xlu1 %1127  ;;  %v1126_v8 = vpop.permute.xlu0 %1125 }
 0x1e5   : > { %1219 = vst.msk [vmem:[#allocation2 + $0x28] sm:$0xff] %vm1213_vm5, %v1128_v63  ;;  %v1148_v9 = vpop.permute.xlu2 %1147 }
 0x1e6   : > { %1218 = vst.msk [vmem:[#allocation2 + $0x20] sm:$0xff] %vm1213_vm5, %v1126_v8 }
 0x1e7   : > { %1229 = vst.msk [vmem:[#allocation2 + $0x78] sm:$0xff] %vm1213_vm5, %v1148_v9 }
 0x1ea   : > { %1729 = vrot.lane.b32.xlu1 %v2507_v13, %s2605_s27  ;;  %1536 = vrot.lane.b32.xlu0 %v2475_v11, %s2606_s28  ;;  %v2478_v13 = vld [vmem:[%s2646_s20 + $0x111] sm:$0xff]  ;;  %v2503_v11 = vld [vmem:[%s2646_s20 + $0xc2] sm:$0xff] }
 0x1eb   : > { %1319 = vrot.lane.b32.xlu2 %v2431_v12, %s2604_s26  ;;  %v2484_v12 = vld [vmem:[%s2646_s20 + $0x159] sm:$0xff] }
 0x1ec   : > { %v1134_v60 = vpop.permute.xlu1 %1133  ;;  %v1132_v16 = vpop.permute.xlu0 %1131 }
 0x1ed   : > { %1222 = vst.msk [vmem:[#allocation2 + $0x40] sm:$0xff] %vm1213_vm5, %v1134_v60  ;;  %v1154_v14 = vpop.permute.xlu2 %1153 }
 0x1ee   : > { %1221 = vst.msk [vmem:[#allocation2 + $0x38] sm:$0xff] %vm1213_vm5, %v1132_v16 }
 0x1ef   : > { %1232 = vst.msk [vmem:[#allocation2 + $0x90] sm:$0xff] %vm1213_vm5, %v1154_v14 }
 0x1f2   : > { %1512 = vrot.lane.b32.xlu1 %v2463_v15, %s2606_s28  ;;  %1331 = vrot.lane.b32.xlu0 %v2437_v19, %s2604_s26  ;;  %v2516_v19 = vld [vmem:[%s2646_s20 + $0x15a] sm:$0xff] }
 0x1f3   : > { %1524 = vrot.lane.b32.xlu2 %v2469_v17, %s2606_s28  ;;  %v2510_v17 = vld [vmem:[%s2646_s20 + $0x112] sm:$0xff] }
 0x1f4   : > { %v1140_v18 = vpop.permute.xlu1 %1139  ;;  %v1138_v22 = vpop.permute.xlu0 %1137 }
 0x1f5   : > { %1225 = vst.msk [vmem:[#allocation2 + $0x58] sm:$0xff] %vm1213_vm5, %v1140_v18  ;;  %v1160_v20 = vpop.permute.xlu2 %1159  ;;  %v2434_v18 = vld [vmem:[%s2646_s20 + $0x80] sm:$0xff] }
 0x1f6   : > { %1224 = vst.msk [vmem:[#allocation2 + $0x50] sm:$0xff] %vm1213_vm5, %v1138_v22 }
 0x1f7   : > { %1235 = vst.msk [vmem:[#allocation2 + $0xa8] sm:$0xff] %vm1213_vm5, %v1160_v20 }
 0x1fa   : > { %1705 = vrot.lane.b32.xlu1 %v2495_v21, %s2605_s27  ;;  %1345 = vrot.lane.b32.xlu0 %v3028_v58, %s2604_s26 }
 0x1fb   : > { %1717 = vrot.lane.b32.xlu2 %v2501_v23, %s2605_s27  ;;  %v2466_v23 = vld [vmem:[%s2646_s20 + $0x81] sm:$0xff] }
 0x1fc   : > { %v1146_v25 = vpop.permute.xlu1 %1145  ;;  %v1144_v24 = vpop.permute.xlu0 %1143 }
 0x1fd   : > { %1228 = vst.msk [vmem:[#allocation2 + $0x70] sm:$0xff] %vm1213_vm5, %v1146_v25  ;;  %v1166_v43 = vpop.permute.xlu2 %1165  ;;  %v2440_v25 = vld [vmem:[%s2646_s20 + $0xc8] sm:$0xff] }
 0x1fe   : > { %1227 = vst.msk [vmem:[#allocation2 + $0x68] sm:$0xff] %vm1213_vm5, %v1144_v24  ;;  %v2472_v24 = vld [vmem:[%s2646_s20 + $0xc9] sm:$0xff] }
 0x1ff   : > { %1238 = vst.msk [vmem:[#allocation2 + $0xc0] sm:$0xff] %vm1213_vm5, %v1166_v43 }
 0x202   : > { %1731 = vrot.lane.b32.xlu1 %v2508_v28, %s2605_s27  ;;  %1538 = vrot.lane.b32.xlu0 %v2476_v26, %s2606_s28 }
 0x203   : > { %1321 = vrot.lane.b32.xlu2 %v2432_v47, %s2604_s26 }
 0x204   : > { %v1152_v58 = vpop.permute.xlu1 %1151  ;;  %v1150_v55 = vpop.permute.xlu0 %1149 }
 0x205   : > { %1231 = vst.msk [vmem:[#allocation2 + $0x88] sm:$0xff] %vm1213_vm5, %v1152_v58  ;;  %v1172_v27 = vpop.permute.xlu2 %1171 }
 0x206   : > { %1230 = vst.msk [vmem:[#allocation2 + $0x80] sm:$0xff] %vm1213_vm5, %v1150_v55  ;;  %v2447_v55 = vld [vmem:[%s2646_s20 + $0x120] sm:$0xff] }
 0x207   : > { %1241 = vst.msk [vmem:[#allocation2 + $0xd8] sm:$0xff] %vm1213_vm5, %v1172_v27  ;;  %v2453_v27 = vld [vmem:[%s2646_s20 + $0x168] sm:$0xff] }
 0x20a   : > { %1514 = vrot.lane.b32.xlu1 %v2464_v50, %s2606_s28  ;;  %1333 = vrot.lane.b32.xlu0 %v2438_v54, %s2604_s26  ;;  %v2498_v50 = vld [vmem:[%s2646_s20 + $0x82] sm:$0xff] }
 0x20b   : > { %1526 = vrot.lane.b32.xlu2 %v2470_v52, %s2606_s28 }
 0x20c   : > { %v1158_v37 = vpop.permute.xlu1 %1157  ;;  %v1156_v57 = vpop.permute.xlu0 %1155 }
 0x20d   : > { %1234 = vst.msk [vmem:[#allocation2 + $0xa0] sm:$0xff] %vm1213_vm5, %v1158_v37  ;;  %v1312_v33 = vpop.permute.xlu2 %1311 }
 0x20e   : > { %1233 = vst.msk [vmem:[#allocation2 + $0x98] sm:$0xff] %vm1213_vm5, %v1156_v57  ;;  %v2504_v57 = vld [vmem:[%s2646_s20 + $0xca] sm:$0xff] }
 0x20f   : > { %1408 = vst.msk [vmem:[#allocation2] sm:$0xff] %vm1407_vm6, %v1312_v33 }
 0x212   : > { %1359 = vrot.lane.b32.xlu1 %v3090_v34, %s2604_s26  ;;  %1347 = vrot.lane.b32.xlu0 %v2445_v38, %s2604_s26  ;;  %v1858_v34 = vld [vmem:[%s3925_s1] sm:$0xff] }
 0x213   : > { %1707 = vrot.lane.b32.xlu2 %v2496_v56, %s2605_s27  ;;  %1979 = vmatpush.msra.mxu0 %v1858_v34 }
 0x214   : > { %v1164_v61 = vpop.permute.xlu1 %1163  ;;  %v1162_v41 = vpop.permute.xlu0 %1161  ;;  %2571 = vmatpush.msra.mxu1 %v1858_v34  ;;  %2572 = vmatpush.msra.mxu2 %v1858_v34 }
 0x215   : > { %1237 = vst.msk [vmem:[#allocation2 + $0xb8] sm:$0xff] %vm1213_vm5, %v1164_v61  ;;  %v1314_v31 = vpop.permute.xlu2 %1313  ;;  %2573 = vmatpush.msra.mxu3 %v1858_v34  ;;  %v2511_v61 = vld [vmem:[%s2646_s20 + $0x122] sm:$0xff]  ;;  %v2441_v34 = vld [vmem:[%s2646_s20 + $0xd8] sm:$0xff] }
 0x216   : > { %1236 = vst.msk [vmem:[#allocation2 + $0xb0] sm:$0xff] %vm1213_vm5, %v1162_v41  ;;  %v2517_v41 = vld [vmem:[%s2646_s20 + $0x16a] sm:$0xff] }
 0x217   : > { %1409 = vst.msk [vmem:[#allocation2 + $0x8] sm:$0xff] %vm1407_vm6, %v1314_v31 }
 0x21a   : > { %1540 = vrot.lane.b32.xlu1 %v2477_v53, %s2606_s28  ;;  %1719 = vrot.lane.b32.xlu0 %v2502_v42, %s2605_s27 }
 0x21b   : > { %1552 = vrot.lane.b32.xlu2 %v2483_v51, %s2606_s28 }
 0x21c   : > { %v1170_v46 = vpop.permute.xlu1 %1169  ;;  %v1168_v49 = vpop.permute.xlu0 %1167 }
 0x21d   : > { %1240 = vst.msk [vmem:[#allocation2 + $0xd0] sm:$0xff] %vm1213_vm5, %v1170_v46  ;;  %v1316_v44 = vpop.permute.xlu2 %1315  ;;  %v2473_v46 = vld [vmem:[%s2646_s20 + $0xd9] sm:$0xff] }
 0x21e   : > { %1239 = vst.msk [vmem:[#allocation2 + $0xc8] sm:$0xff] %vm1213_vm5, %v1168_v49  ;;  %v2448_v49 = vld [vmem:[%s2646_s20 + $0x128] sm:$0xff] }
 0x21f   : > { %1410 = vst.msk [vmem:[#allocation2 + $0x10] sm:$0xff] %vm1407_vm6, %v1316_v44  ;;  %v2454_v44 = vld [vmem:[%s2646_s20 + $0x170] sm:$0xff] }
 0x222   : > { %1745 = vrot.lane.b32.xlu1 %v2515_v35, %s2605_s27  ;;  %1733 = vrot.lane.b32.xlu0 %v2509_v40, %s2605_s27 }
 0x223   : > { %1323 = vrot.lane.b32.xlu2 %v2433_v39, %s2604_s26 }
 0x224   : > { %v1176_v36 = vpop.permute.xlu1 %1175  ;;  %v1174_v29 = vpop.permute.xlu0 %1173 }
 0x225   : > { %1243 = vst.msk [vmem:[#allocation2 + $0xe8] sm:$0xff] %vm1213_vm5, %v1176_v36  ;;  %v1521_v30 = vpop.permute.xlu2 %1520  ;;  %v2505_v36 = vld [vmem:[%s2646_s20 + $0xda] sm:$0xff] }
 0x226   : > { %1242 = vst.msk [vmem:[#allocation2 + $0xe0] sm:$0xff] %vm1213_vm5, %v1174_v29  ;;  %v2480_v29 = vld [vmem:[%s2646_s20 + $0x129] sm:$0xff] }
 0x22a   : > { %1516 = vrot.lane.b32.xlu1 %v2465_v4, %s2606_s28  ;;  %1335 = vrot.lane.b32.xlu0 %v2439_v45, %s2604_s26  ;;  %v2486_v4 = vld [vmem:[%s2646_s20 + $0x171] sm:$0xff] }
 0x22b   : > { %1528 = vrot.lane.b32.xlu2 %v2471_v48, %s2606_s28 }
 0x22c   : > { %v1698_v0 = vpop.permute.xlu1 %1697  ;;  %v1505_v3 = vpop.permute.xlu0 %1504 }
 0x22d   : > { %1601 = vst.msk [vmem:[#allocation2] sm:$0xff] %vm1600_vm8, %v1505_v3  ;;  %v1318_v2 = vpop.permute.xlu2 %1317 }
 0x22e   : > { %1794 = vst.msk [vmem:[#allocation2] sm:$0xff] %vm1793_vm9, %v1698_v0 }
 0x22f   : > { %1411 = vst.msk [vmem:[#allocation2 + $0x18] sm:$0xff] %vm1407_vm6, %v1318_v2  ;;  %v2512_v2 = vld [vmem:[%s2646_s20 + $0x12a] sm:$0xff] }
 0x232   : > { %1361 = vrot.lane.b32.xlu1 %v2452_v7, %s2604_s26  ;;  %1349 = vrot.lane.b32.xlu0 %v2446_v5, %s2604_s26  ;;  %v2518_v7 = vld [vmem:[%s2646_s20 + $0x172] sm:$0xff]  ;;  %v2442_v5 = vld [vmem:[%s2646_s20 + $0xe0] sm:$0xff] }
 0x233   : > { %1709 = vrot.lane.b32.xlu2 %v2497_v6, %s2605_s27 }
 0x234   : > { %v1700_v10 = vpop.permute.xlu1 %1699  ;;  %v1507_v63 = vpop.permute.xlu0 %1506 }
 0x235   : > { %1602 = vst.msk [vmem:[#allocation2 + $0x8] sm:$0xff] %vm1600_vm8, %v1507_v63  ;;  %v1826_v8 = vld [vmem:[#allocation2] sm:$0xff]  ;;  %v1523_v9 = vpop.permute.xlu2 %1522 }
 0x236   : > { %1795 = vst.msk [vmem:[#allocation2 + $0x8] sm:$0xff] %vm1793_vm9, %v1700_v10  ;;  %2524 = vmatmul.msk.f32.vlgmr.msra.gmra.mxu0 %vm1863_vm10, %v1826_v8 }
 0x23a   : > { %1542 = vrot.lane.b32.xlu1 %v2478_v13, %s2606_s28  ;;  %1721 = vrot.lane.b32.xlu0 %v2503_v11, %s2605_s27  ;;  %v2449_v13 = vld [vmem:[%s2646_s20 + $0x138] sm:$0xff]  ;;  %v2455_v11 = vld [vmem:[%s2646_s20 + $0x180] sm:$0xff] }
 0x23b   : > { %1554 = vrot.lane.b32.xlu2 %v2484_v12, %s2606_s28 }
 0x23c   : > { %v1509_v60 = vpop.permute.xlu1 %1508  ;;  %v1328_v16 = vpop.permute.xlu0 %1327 }
 0x23d   : > { %1603 = vst.msk [vmem:[#allocation2 + $0x10] sm:$0xff] %vm1600_vm8, %v1509_v60  ;;  %v1827_v14 = vld [vmem:[#allocation2 + $0x8] sm:$0xff]  ;;  %v1716_v15 = vpop.permute.xlu2 %1715 }
 0x23e   : > { %1416 = vst.msk [vmem:[#allocation2 + $0x40] sm:$0xff] %vm1407_vm6, %v1328_v16  ;;  %2525 = vmatmul.msk.f32.gmra.mxu0 %vm1863_vm10, %v1827_v14 }
 0x23f   : > { %1609 = vst.msk [vmem:[#allocation2 + $0x40] sm:$0xff] %vm1600_vm8, %v1521_v30 }
 0x242   : > { %1747 = vrot.lane.b32.xlu1 %v2516_v19, %s2605_s27  ;;  %1735 = vrot.lane.b32.xlu0 %v2510_v17, %s2605_s27  ;;  %v2481_v19 = vld [vmem:[%s2646_s20 + $0x139] sm:$0xff]  ;;  %v2487_v17 = vld [vmem:[%s2646_s20 + $0x181] sm:$0xff] }
 0x243   : > { %1325 = vrot.lane.b32.xlu2 %v2434_v18, %s2604_s26 }
 0x244   : > { %v1714_v22 = vpop.permute.xlu1 %1713  ;;  %v1702_v20 = vpop.permute.xlu0 %1701 }
 0x245   : > { %1802 = vst.msk [vmem:[#allocation2 + $0x40] sm:$0xff] %vm1793_vm9, %v1714_v22  ;;  %v1320_v21 = vpop.permute.xlu2 %1319 }
 0x246   : > { %1796 = vst.msk [vmem:[#allocation2 + $0x10] sm:$0xff] %vm1793_vm9, %v1702_v20 }
 0x247   : > { %1412 = vst.msk [vmem:[#allocation2 + $0x20] sm:$0xff] %vm1407_vm6, %v1320_v21  ;;  %v2513_v21 = vld [vmem:[%s2646_s20 + $0x13a] sm:$0xff] }
 0x24a   : > { %1518 = vrot.lane.b32.xlu1 %v2466_v23, %s2606_s28  ;;  %1337 = vrot.lane.b32.xlu0 %v2440_v25, %s2604_s26  ;;  %v2519_v23 = vld [vmem:[%s2646_s20 + $0x182] sm:$0xff] }
 0x24b   : > { %1530 = vrot.lane.b32.xlu2 %v2472_v24, %s2606_s28  ;;  %v2450_v25 = vld [vmem:[%s2646_s20 + $0x140] sm:$0xff] }
 0x24c   : > { %v1511_v43 = vpop.permute.xlu1 %1510  ;;  %v1330_v28 = vpop.permute.xlu0 %1329  ;;  %v1834_v26 = vld [vmem:[#allocation2 + $0x40] sm:$0xff] }
 0x24d   : > { %1604 = vst.msk [vmem:[#allocation2 + $0x18] sm:$0xff] %vm1600_vm8, %v1511_v43  ;;  %v1828_v47 = vld [vmem:[#allocation2 + $0x10] sm:$0xff]  ;;  %2532 = vmatmul.msk.f32.vlgmr.msra.gmra.mxu1 %vm1863_vm10, %v1834_v26  ;;  %v1525_v58 = vpop.permute.xlu2 %1524 }
 0x24e   : > { %1417 = vst.msk [vmem:[#allocation2 + $0x48] sm:$0xff] %vm1407_vm6, %v1330_v28  ;;  %2526 = vmatmul.msk.f32.gmra.mxu0 %vm1863_vm10, %v1828_v47  ;;  %v2456_v47 = vld [vmem:[%s2646_s20 + $0x188] sm:$0xff] }
 0x24f   : > { %1610 = vst.msk [vmem:[#allocation2 + $0x48] sm:$0xff] %vm1600_vm8, %v1523_v9  ;;  %v2474_v9 = vld [vmem:[%s2646_s20 + $0xe1] sm:$0xff] }
 0x250   : > { %1803 = vst.msk [vmem:[#allocation2 + $0x48] sm:$0xff] %vm1793_vm9, %v1716_v15  ;;  %v2506_v15 = vld [vmem:[%s2646_s20 + $0xe2] sm:$0xff] }
 0x252   : > { %1351 = vrot.lane.b32.xlu0 %v2447_v55, %s2604_s26  ;;  %1363 = vrot.lane.b32.xlu1 %v2453_v27, %s2604_s26  ;;  %v2488_v55 = vld [vmem:[%s2646_s20 + $0x189] sm:$0xff] }
 0x253   : > { %1711 = vrot.lane.b32.xlu2 %v2498_v50, %s2605_s27 }
 0x254   : > { %v1704_v54 = vpop.permute.xlu1 %1703  ;;  %v1344_v52 = vpop.permute.xlu0 %1343 }
 0x255   : > { %1797 = vst.msk [vmem:[#allocation2 + $0x18] sm:$0xff] %vm1793_vm9, %v1704_v54  ;;  %v1718_v37 = vpop.permute.xlu2 %1717 }
 0x256   : > { %1424 = vst.msk [vmem:[#allocation2 + $0x80] sm:$0xff] %vm1407_vm6, %v1344_v52 }
 0x257   : > { %v1835_v33 = vld [vmem:[#allocation2 + $0x48] sm:$0xff] }
 0x258   : > { %2533 = vmatmul.msk.f32.gmra.mxu1 %vm1863_vm10, %v1835_v33 }
 0x25a   : > { %1723 = vrot.lane.b32.xlu0 %v2504_v57, %s2605_s27  ;;  %1544 = vrot.lane.b32.xlu1 %v2479_v59, %s2606_s28  ;;  %v2514_v57 = vld [vmem:[%s2646_s20 + $0x142] sm:$0xff]  ;;  %v2520_v59 = vld [vmem:[%s2646_s20 + $0x18a] sm:$0xff] }
 0x25b   : > { %1556 = vrot.lane.b32.xlu2 %v2485_v62, %s2606_s28 }
 0x25c   : > { %v1730_v38 = vpop.permute.xlu1 %1729  ;;  %v1537_v32 = vpop.permute.xlu0 %1536  ;;  %v1829_v56 = vld [vmem:[#allocation2 + $0x18] sm:$0xff] }
 0x25d   : > { %1617 = vst.msk [vmem:[#allocation2 + $0x80] sm:$0xff] %vm1600_vm8, %v1537_v32  ;;  %2527 = vmatmul.msk.f32.gmra.mxu0 %vm1863_vm10, %v1829_v56  ;;  %v1322_v1 = vpop.permute.xlu2 %1321  ;;  %v2457_v56 = vld [vmem:[%s2646_s20 + $0x198] sm:$0xff] }
 0x25e   : > { %1810 = vst.msk [vmem:[#allocation2 + $0x80] sm:$0xff] %vm1793_vm9, %v1730_v38 }
 0x25f   : > { %1413 = vst.msk [vmem:[#allocation2 + $0x28] sm:$0xff] %vm1407_vm6, %v1322_v1  ;;  %v2489_v1 = vld [vmem:[%s2646_s20 + $0x199] sm:$0xff] }
 0x262   : > { %1737 = vrot.lane.b32.xlu0 %v2511_v61, %s2605_s27  ;;  %1749 = vrot.lane.b32.xlu1 %v2517_v41, %s2605_s27  ;;  %v2521_v61 = vld [vmem:[%s2646_s20 + $0x19a] sm:$0xff] }
 0x263   : > { %1339 = vrot.lane.b32.xlu2 %v2441_v34, %s2604_s26 }
 0x264   : > { %v1513_v31 = vpop.permute.xlu1 %1512  ;;  %v1332_v53 = vpop.permute.xlu0 %1331 }
 0x265   : > { %1605 = vst.msk [vmem:[#allocation2 + $0x20] sm:$0xff] %vm1600_vm8, %v1513_v31  ;;  %v1842_v42 = vld [vmem:[#allocation2 + $0x80] sm:$0xff]  ;;  %v1527_v51 = vpop.permute.xlu2 %1526 }
 0x266   : > { %1418 = vst.msk [vmem:[#allocation2 + $0x50] sm:$0xff] %vm1407_vm6, %v1332_v53  ;;  %2540 = vmatmul.msk.f32.vlgmr.msra.gmra.mxu2 %vm1863_vm10, %v1842_v42  ;;  %v2458_v53 = vld [vmem:[%s2646_s20 + $0x1a0] sm:$0xff] }
 0x267   : > { %1611 = vst.msk [vmem:[#allocation2 + $0x50] sm:$0xff] %vm1600_vm8, %v1525_v58  ;;  %v2482_v58 = vld [vmem:[%s2646_s20 + $0x141] sm:$0xff] }
 0x268   : > { %1804 = vst.msk [vmem:[#allocation2 + $0x50] sm:$0xff] %vm1793_vm9, %v1718_v37  ;;  %v2490_v42 = vld [vmem:[%s2646_s20 + $0x1a1] sm:$0xff] }
 0x26a   : > { %1532 = vrot.lane.b32.xlu0 %v2473_v46, %s2606_s28  ;;  %1353 = vrot.lane.b32.xlu1 %v2448_v49, %s2604_s26 }
 0x26b   : > { %1365 = vrot.lane.b32.xlu2 %v2454_v44, %s2604_s26 }
 0x26c   : > { %v1706_v35 = vpop.permute.xlu1 %1705  ;;  %v1346_v40 = vpop.permute.xlu0 %1345 }
 0x26d   : > { %1798 = vst.msk [vmem:[#allocation2 + $0x20] sm:$0xff] %vm1793_vm9, %v1706_v35  ;;  %v1708_v39 = vpop.permute.xlu2 %1707 }
 0x26e   : > { %1425 = vst.msk [vmem:[#allocation2 + $0x88] sm:$0xff] %vm1407_vm6, %v1346_v40  ;;  %v2522_v40 = vld [vmem:[%s2646_s20 + $0x1a2] sm:$0xff] }
 0x26f   : > { %v1836_v30 = vld [vmem:[#allocation2 + $0x50] sm:$0xff] }
 0x270   : > { %2534 = vmatmul.msk.f32.gmra.mxu1 %vm1863_vm10, %v1836_v30 }
 0x272   : > { %1725 = vrot.lane.b32.xlu0 %v2505_v36, %s2605_s27  ;;  %1546 = vrot.lane.b32.xlu1 %v2480_v29, %s2606_s28 }
 0x273   : > { %1558 = vrot.lane.b32.xlu2 %v2486_v4, %s2606_s28 }
 0x274   : > { %v1732_v45 = vpop.permute.xlu1 %1731  ;;  %v1539_v48 = vpop.permute.xlu0 %1538  ;;  %v1830_v0 = vld [vmem:[#allocation2 + $0x20] sm:$0xff] }
 0x275   : > { %1618 = vst.msk [vmem:[#allocation2 + $0x88] sm:$0xff] %vm1600_vm8, %v1539_v48  ;;  %2528 = vmatmul.msk.f32.gmra.mxu0 %vm1863_vm10, %v1830_v0  ;;  %v1553_v3 = vpop.permute.xlu2 %1552 }
 0x276   : > { %1811 = vst.msk [vmem:[#allocation2 + $0x88] sm:$0xff] %vm1793_vm9, %v1732_v45 }
 0x27a   : > { %1739 = vrot.lane.b32.xlu0 %v2512_v2, %s2605_s27  ;;  %1751 = vrot.lane.b32.xlu1 %v2518_v7, %s2605_s27 }
 0x27b   : > { %1341 = vrot.lane.b32.xlu2 %v2442_v5, %s2604_s26 }
 0x27c   : > { %v1515_v6 = vpop.permute.xlu1 %1514  ;;  %v1334_v10 = vpop.permute.xlu0 %1333 }
 0x27d   : > { %1606 = vst.msk [vmem:[#allocation2 + $0x28] sm:$0xff] %vm1600_vm8, %v1515_v6  ;;  %v1843_v63 = vld [vmem:[#allocation2 + $0x88] sm:$0xff]  ;;  %v1324_v8 = vpop.permute.xlu2 %1323 }
 0x27e   : > { %1419 = vst.msk [vmem:[#allocation2 + $0x58] sm:$0xff] %vm1407_vm6, %v1334_v10  ;;  %2541 = vmatmul.msk.f32.gmra.mxu2 %vm1863_vm10, %v1843_v63 }
 0x27f   : > { %1612 = vst.msk [vmem:[#allocation2 + $0x58] sm:$0xff] %vm1600_vm8, %v1527_v51 }
 0x280   : > { %1799 = vst.msk [vmem:[#allocation2 + $0x28] sm:$0xff] %vm1793_vm9, %v1708_v39 }
 0x281   : > { %1414 = vst.msk [vmem:[#allocation2 + $0x30] sm:$0xff] %vm1407_vm6, %v1324_v8 }
 0x282   : > { %1534 = vrot.lane.b32.xlu0 %v2474_v9, %s2606_s28  ;;  %1355 = vrot.lane.b32.xlu1 %v2449_v13, %s2604_s26 }
 0x283   : > { %1367 = vrot.lane.b32.xlu2 %v2455_v11, %s2604_s26 }
 0x284   : > { %v1360_v12 = vpop.permute.xlu1 %1359  ;;  %v1348_v60 = vpop.permute.xlu0 %1347 }
 0x285   : > { %1432 = vst.msk [vmem:[#allocation2 + $0xc0] sm:$0xff] %vm1407_vm6, %v1360_v12  ;;  %v1529_v16 = vpop.permute.xlu2 %1528 }
 0x286   : > { %1426 = vst.msk [vmem:[#allocation2 + $0x90] sm:$0xff] %vm1407_vm6, %v1348_v60 }
 0x287   : > { %1625 = vst.msk [vmem:[#allocation2 + $0xc0] sm:$0xff] %vm1600_vm8, %v1553_v3  ;;  %v1831_v14 = vld [vmem:[#allocation2 + $0x28] sm:$0xff] }
 0x288   : > { %2529 = vmatmul.msk.f32.gmra.mxu0 %vm1863_vm10, %v1831_v14 }
 0x28a   : > { %1727 = vrot.lane.b32.xlu0 %v2506_v15, %s2605_s27  ;;  %1548 = vrot.lane.b32.xlu1 %v2481_v19, %s2606_s28 }
 0x28b   : > { %1560 = vrot.lane.b32.xlu2 %v2487_v17, %s2606_s28 }
 0x28c   : > { %v1541_v18 = vpop.permute.xlu1 %1540  ;;  %v1720_v22 = vpop.permute.xlu0 %1719 }
 0x28d   : > { %1619 = vst.msk [vmem:[#allocation2 + $0x90] sm:$0xff] %vm1600_vm8, %v1541_v18  ;;  %v1710_v20 = vpop.permute.xlu2 %1709 }
 0x28e   : > { %1805 = vst.msk [vmem:[#allocation2 + $0x58] sm:$0xff] %vm1793_vm9, %v1720_v22 }
 0x292   : > { %1741 = vrot.lane.b32.xlu0 %v2513_v21, %s2605_s27  ;;  %1753 = vrot.lane.b32.xlu1 %v2519_v23, %s2605_s27 }
 0x293   : > { %1357 = vrot.lane.b32.xlu2 %v2450_v25, %s2604_s26 }
 0x294   : > { %v1746_v24 = vpop.permute.xlu1 %1745  ;;  %v1734_v43 = vpop.permute.xlu0 %1733 }
 0x295   : > { %1818 = vst.msk [vmem:[#allocation2 + $0xc0] sm:$0xff] %vm1793_vm9, %v1746_v24  ;;  %v1837_v28 = vld [vmem:[#allocation2 + $0x58] sm:$0xff]  ;;  %v1555_v26 = vpop.permute.xlu2 %1554 }
 0x296   : > { %1812 = vst.msk [vmem:[#allocation2 + $0x90] sm:$0xff] %vm1793_vm9, %v1734_v43  ;;  %2535 = vmatmul.msk.f32.gmra.mxu1 %vm1863_vm10, %v1837_v28 }
 0x29a   : > { %1369 = vrot.lane.b32.xlu0 %v2456_v47, %s2604_s26  ;;  %1550 = vrot.lane.b32.xlu1 %v2482_v58, %s2606_s28 }
 0x29b   : > { %1562 = vrot.lane.b32.xlu2 %v2488_v55, %s2606_s28 }
 0x29c   : > { %v1517_v27 = vpop.permute.xlu1 %1516  ;;  %v1336_v50 = vpop.permute.xlu0 %1335  ;;  %v1850_v54 = vld [vmem:[#allocation2 + $0xc0] sm:$0xff] }
 0x29d   : > { %1607 = vst.msk [vmem:[#allocation2 + $0x30] sm:$0xff] %vm1600_vm8, %v1517_v27  ;;  %v1844_v52 = vld [vmem:[#allocation2 + $0x90] sm:$0xff]  ;;  %2548 = vmatmul.msk.f32.vlgmr.msra.gmra.mxu3 %vm1863_vm10, %v1850_v54  ;;  %v1326_v37 = vpop.permute.xlu2 %1325 }
 0x29e   : > { %1420 = vst.msk [vmem:[#allocation2 + $0x60] sm:$0xff] %vm1407_vm6, %v1336_v50  ;;  %2542 = vmatmul.msk.f32.gmra.mxu2 %vm1863_vm10, %v1844_v52 }
 0x29f   : > { %1613 = vst.msk [vmem:[#allocation2 + $0x60] sm:$0xff] %vm1600_vm8, %v1529_v16 }
 0x2a0   : > { %1800 = vst.msk [vmem:[#allocation2 + $0x30] sm:$0xff] %vm1793_vm9, %v1710_v20 }
 0x2a1   : > { %1415 = vst.msk [vmem:[#allocation2 + $0x38] sm:$0xff] %vm1407_vm6, %v1326_v37 }
 0x2a2   : > { %1743 = vrot.lane.b32.xlu0 %v2514_v57, %s2605_s27  ;;  %1755 = vrot.lane.b32.xlu1 %v2520_v59, %s2605_s27 }
 0x2a3   : > { %1177 = vrot.lane.b32.xlu2 %v2519_v23, %s2603_s25 }
 0x2a4   : > { %v1362_v33 = vpop.permute.xlu1 %1361  ;;  %v1350_v62 = vpop.permute.xlu0 %1349 }
 0x2a5   : > { %1433 = vst.msk [vmem:[#allocation2 + $0xc8] sm:$0xff] %vm1407_vm6, %v1362_v33  ;;  %v1531_v38 = vpop.permute.xlu2 %1530 }
 0x2a6   : > { %1427 = vst.msk [vmem:[#allocation2 + $0x98] sm:$0xff] %vm1407_vm6, %v1350_v62 }
 0x2a7   : > { %1626 = vst.msk [vmem:[#allocation2 + $0xc8] sm:$0xff] %vm1600_vm8, %v1555_v26  ;;  %v1832_v32 = vld [vmem:[#allocation2 + $0x30] sm:$0xff] }
 0x2a8   : > { %2530 = vmatmul.msk.f32.gmra.mxu0 %vm1863_vm10, %v1832_v32 }
 0x2aa   : > { %1371 = vrot.lane.b32.xlu0 %v2457_v56, %s2604_s26  ;;  %1564 = vrot.lane.b32.xlu1 %v2489_v1, %s2606_s28 }
 0x2ab   : > { %1757 = vrot.lane.b32.xlu2 %v2521_v61, %s2605_s27 }
 0x2ac   : > { %v1543_v41 = vpop.permute.xlu1 %1542  ;;  %v1722_v34 = vpop.permute.xlu0 %1721 }
 0x2ad   : > { %1620 = vst.msk [vmem:[#allocation2 + $0x98] sm:$0xff] %vm1600_vm8, %v1543_v41  ;;  %v1712_v31 = vpop.permute.xlu2 %1711 }
 0x2ae   : > { %1806 = vst.msk [vmem:[#allocation2 + $0x60] sm:$0xff] %vm1793_vm9, %v1722_v34 }
 0x2b2   : > { %1179 = vrot.lane.b32.xlu0 %v2520_v59, %s2603_s25  ;;  %1373 = vrot.lane.b32.xlu1 %v2458_v53, %s2604_s26 }
 0x2b3   : > { %v1981_v51 = vpop.f32.mrf.mxu0  ;;  %1566 = vrot.lane.b32.xlu2 %v2490_v42, %s2606_s28 }
 0x2b4   : > { %2078 = vst.msk [vmem:[%s3731_s18] sm:$0xff] %vm2077_vm11, %v1981_v51  ;;  %v1748_v46 = vpop.permute.xlu1 %1747  ;;  %v1736_v49 = vpop.permute.xlu0 %1735  ;;  %v2148_v36 = vmul.f32 %v1981_v51, %v1981_v51 }
 0x2b5   : > { %1819 = vst.msk [vmem:[#allocation2 + $0xc8] sm:$0xff] %vm1793_vm9, %v1748_v46  ;;  %v1838_v44 = vld [vmem:[#allocation2 + $0x60] sm:$0xff]  ;;  %v1557_v35 = vpop.permute.xlu2 %1556 }
 0x2b6   : > { %1813 = vst.msk [vmem:[#allocation2 + $0x98] sm:$0xff] %vm1793_vm9, %v1736_v49  ;;  %2536 = vmatmul.msk.f32.gmra.mxu1 %vm1863_vm10, %v1838_v44 }
 0x2ba   : > { %1759 = vrot.lane.b32.xlu0 %v2522_v40, %s2605_s27 }
 0x2bb   : > { %v1984_v39 = vpop.f32.mrf.mxu0 }
 0x2bc   : > { %2079 = vst.msk [vmem:[%s3731_s18 + $0x8] sm:$0xff] %vm2077_vm11, %v1984_v39  ;;  %v2110_v29 = vadd.f32 %v1984_v39, %v1981_v51  ;;  %v2149_v30 = vmul.f32 %v1984_v39, %v1984_v39  ;;  %v1519_v4 = vpop.permute.xlu1 %1518  ;;  %v1338_v45 = vpop.permute.xlu0 %1337  ;;  %v1851_v48 = vld [vmem:[#allocation2 + $0xc8] sm:$0xff] }
 0x2bd   : > { %1608 = vst.msk [vmem:[#allocation2 + $0x38] sm:$0xff] %vm1600_vm8, %v1519_v4  ;;  %v1845_v0 = vld [vmem:[#allocation2 + $0x98] sm:$0xff]  ;;  %2549 = vmatmul.msk.f32.gmra.mxu3 %vm1863_vm10, %v1851_v48  ;;  %v1340_v2 = vpop.permute.xlu2 %1339 }
 0x2be   : > { %v2180_v3 = vadd.f32 %v2149_v30, %v2148_v36  ;;  %1421 = vst.msk [vmem:[#allocation2 + $0x68] sm:$0xff] %vm1407_vm6, %v1338_v45  ;;  %2543 = vmatmul.msk.f32.gmra.mxu2 %vm1863_vm10, %v1845_v0 }
 0x2bf   : > { %1614 = vst.msk [vmem:[#allocation2 + $0x68] sm:$0xff] %vm1600_vm8, %v1531_v38 }
 0x2c0   : > { %1801 = vst.msk [vmem:[#allocation2 + $0x38] sm:$0xff] %vm1793_vm9, %v1712_v31 }
 0x2c1   : > { %1422 = vst.msk [vmem:[#allocation2 + $0x70] sm:$0xff] %vm1407_vm6, %v1340_v2 }
 0x2c4   : > { %v1352_v7 = vpop.permute.xlu0 %1351  ;;  %v1364_v5 = vpop.permute.xlu1 %1363 }
 0x2c5   : > { %1428 = vst.msk [vmem:[#allocation2 + $0xa0] sm:$0xff] %vm1407_vm6, %v1352_v7  ;;  %v1366_v6 = vpop.permute.xlu2 %1365 }
 0x2c6   : > { %1434 = vst.msk [vmem:[#allocation2 + $0xd0] sm:$0xff] %vm1407_vm6, %v1364_v5 }
 0x2c7   : > { %v1833_v10 = vld [vmem:[#allocation2 + $0x38] sm:$0xff]  ;;  %1627 = vst.msk [vmem:[#allocation2 + $0xd0] sm:$0xff] %vm1600_vm8, %v1557_v35 }
 0x2c8   : > { %2531 = vmatmul.msk.f32.gmra.mxu0 %vm1863_vm10, %v1833_v10  ;;  %1435 = vst.msk [vmem:[#allocation2 + $0xd8] sm:$0xff] %vm1407_vm6, %v1366_v6 }
 0x2ca   : > { %v3758_v63 = vpop.f32.mrf.mxu1 }
 0x2cb   : > { %v1987_v8 = vpop.f32.mrf.mxu0  ;;  %2086 = vst.msk [vmem:[%s3731_s18 + $0x40] sm:$0xff] %vm2077_vm11, %v3758_v63 }
 0x2cc   : > { %2080 = vst.msk [vmem:[%s3731_s18 + $0x10] sm:$0xff] %vm2077_vm11, %v1987_v8  ;;  %v2111_v9 = vadd.f32 %v2110_v29, %v1987_v8  ;;  %v2150_v13 = vmul.f32 %v1987_v8, %v1987_v8  ;;  %v1724_v11 = vpop.permute.xlu0 %1723  ;;  %v1545_v12 = vpop.permute.xlu1 %1544 }
 0x2cd   : > { %1807 = vst.msk [vmem:[#allocation2 + $0x68] sm:$0xff] %vm1793_vm9, %v1724_v11  ;;  %v1559_v16 = vpop.permute.xlu2 %1558 }
 0x2ce   : > { %v2181_v60 = vadd.f32 %v2180_v3, %v2150_v13  ;;  %1621 = vst.msk [vmem:[#allocation2 + $0xa0] sm:$0xff] %vm1600_vm8, %v1545_v12 }
 0x2cf   : > { %1628 = vst.msk [vmem:[#allocation2 + $0xd8] sm:$0xff] %vm1600_vm8, %v1559_v16 }
 0x2d4   : > { %v1738_v14 = vpop.permute.xlu0 %1737  ;;  %v1839_v15 = vld [vmem:[#allocation2 + $0x68] sm:$0xff]  ;;  %v1750_v19 = vpop.permute.xlu1 %1749 }
 0x2d5   : > { %1814 = vst.msk [vmem:[#allocation2 + $0xa0] sm:$0xff] %vm1793_vm9, %v1738_v14  ;;  %2537 = vmatmul.msk.f32.gmra.mxu1 %vm1863_vm10, %v1839_v15  ;;  %v3770_v17 = vpop.f32.mrf.mxu1  ;;  %v1342_v18 = vpop.permute.xlu2 %1341 }
 0x2d6   : > { %1820 = vst.msk [vmem:[#allocation2 + $0xd0] sm:$0xff] %vm1793_vm9, %v1750_v19 }
 0x2d7   : > { %2087 = vst.msk [vmem:[%s3731_s18 + $0x48] sm:$0xff] %vm2077_vm11, %v3770_v17 }
 0x2d8   : > { %1423 = vst.msk [vmem:[#allocation2 + $0x78] sm:$0xff] %vm1407_vm6, %v1342_v18 }
 0x2da   : > { %v1990_v22 = vpop.f32.mrf.mxu0 }
 0x2db   : > { %2081 = vst.msk [vmem:[%s3731_s18 + $0x18] sm:$0xff] %vm2077_vm11, %v1990_v22  ;;  %v2112_v20 = vadd.f32 %v2111_v9, %v1990_v22  ;;  %v2151_v21 = vmul.f32 %v1990_v22, %v1990_v22 }
 0x2dc   : > { %v1533_v23 = vpop.permute.xlu0 %1532  ;;  %v1846_v25 = vld [vmem:[#allocation2 + $0xa0] sm:$0xff]  ;;  %v1354_v24 = vpop.permute.xlu1 %1353 }
 0x2dd   : > { %v2182_v43 = vadd.f32 %v2181_v60, %v2151_v21  ;;  %1615 = vst.msk [vmem:[#allocation2 + $0x70] sm:$0xff] %vm1600_vm8, %v1533_v23  ;;  %2544 = vmatmul.msk.f32.gmra.mxu2 %vm1863_vm10, %v1846_v25  ;;  %v1852_v28 = vld [vmem:[#allocation2 + $0xd0] sm:$0xff]  ;;  %v1368_v26 = vpop.permute.xlu2 %1367 }
 0x2de   : > { %1429 = vst.msk [vmem:[#allocation2 + $0xa8] sm:$0xff] %vm1407_vm6, %v1354_v24  ;;  %2550 = vmatmul.msk.f32.gmra.mxu3 %vm1863_vm10, %v1852_v28 }
 0x2df   : > { %1436 = vst.msk [vmem:[#allocation2 + $0xe0] sm:$0xff] %vm1407_vm6, %v1368_v26 }
 0x2e4   : > { %v1726_v47 = vpop.permute.xlu0 %1725  ;;  %v1547_v58 = vpop.permute.xlu1 %1546 }
 0x2e5   : > { %1808 = vst.msk [vmem:[#allocation2 + $0x70] sm:$0xff] %vm1793_vm9, %v1726_v47  ;;  %v1561_v55 = vpop.permute.xlu2 %1560  ;;  %v2157_v47 = vmul.f32 %v3770_v17, %v3770_v17 }
 0x2e6   : > { %1622 = vst.msk [vmem:[#allocation2 + $0xa8] sm:$0xff] %vm1600_vm8, %v1547_v58 }
 0x2e7   : > { %1629 = vst.msk [vmem:[#allocation2 + $0xe0] sm:$0xff] %vm1600_vm8, %v1561_v55 }
 0x2e9   : > { %v3787_v27 = vpop.f32.mrf.mxu2 }
 0x2ea   : > { %2094 = vst.msk [vmem:[%s3731_s18 + $0x80] sm:$0xff] %vm2077_vm11, %v3787_v27 }
 0x2ec   : > { %v1740_v50 = vpop.permute.xlu0 %1739  ;;  %v1840_v54 = vld [vmem:[#allocation2 + $0x70] sm:$0xff]  ;;  %v1752_v52 = vpop.permute.xlu1 %1751 }
 0x2ed   : > { %1815 = vst.msk [vmem:[#allocation2 + $0xa8] sm:$0xff] %vm1793_vm9, %v1740_v50  ;;  %2538 = vmatmul.msk.f32.gmra.mxu1 %vm1863_vm10, %v1840_v54  ;;  %v3794_v37 = vpop.f32.mrf.mxu1  ;;  %v1358_v57 = vpop.permute.xlu2 %1357 }
 0x2ee   : > { %1821 = vst.msk [vmem:[#allocation2 + $0xd8] sm:$0xff] %vm1793_vm9, %v1752_v52  ;;  %v2158_v50 = vmul.f32 %v3794_v37, %v3794_v37 }
 0x2ef   : > { %2088 = vst.msk [vmem:[%s3731_s18 + $0x50] sm:$0xff] %vm2077_vm11, %v3794_v37 }
 0x2f0   : > { %1431 = vst.msk [vmem:[#allocation2 + $0xb8] sm:$0xff] %vm1407_vm6, %v1358_v57 }
 0x2f2   : > { %v1993_v59 = vpop.f32.mrf.mxu0 }
 0x2f3   : > { %2082 = vst.msk [vmem:[%s3731_s18 + $0x20] sm:$0xff] %vm2077_vm11, %v1993_v59  ;;  %v2113_v33 = vadd.f32 %v2112_v20, %v1993_v59  ;;  %v2152_v62 = vmul.f32 %v1993_v59, %v1993_v59 }
 0x2f4   : > { %v1535_v38 = vpop.permute.xlu0 %1534  ;;  %v1847_v32 = vld [vmem:[#allocation2 + $0xa8] sm:$0xff]  ;;  %v1356_v56 = vpop.permute.xlu1 %1355 }
 0x2f5   : > { %v2183_v1 = vadd.f32 %v2182_v43, %v2152_v62  ;;  %1616 = vst.msk [vmem:[#allocation2 + $0x78] sm:$0xff] %vm1600_vm8, %v1535_v38  ;;  %2545 = vmatmul.msk.f32.gmra.mxu2 %vm1863_vm10, %v1847_v32  ;;  %v1853_v61 = vld [vmem:[#allocation2 + $0xd8] sm:$0xff]  ;;  %v1563_v41 = vpop.permute.xlu2 %1562  ;;  %v2156_v43 = vmul.f32 %v3758_v63, %v3758_v63 }
 0x2f6   : > { %1430 = vst.msk [vmem:[#allocation2 + $0xb0] sm:$0xff] %vm1407_vm6, %v1356_v56  ;;  %2551 = vmatmul.msk.f32.gmra.mxu3 %vm1863_vm10, %v1853_v61 }
 0x2fc   : > { %v1728_v34 = vpop.permute.xlu0 %1727  ;;  %v1549_v31 = vpop.permute.xlu1 %1548 }
 0x2fd   : > { %1809 = vst.msk [vmem:[#allocation2 + $0x78] sm:$0xff] %vm1793_vm9, %v1728_v34  ;;  %v1178_v53 = vpop.permute.xlu2 %1177 }
 0x2fe   : > { %1623 = vst.msk [vmem:[#allocation2 + $0xb0] sm:$0xff] %vm1600_vm8, %v1549_v31 }
 0x2ff   : > { %1244 = vst.msk [vmem:[#allocation2 + $0xf0] sm:$0xff] %vm1213_vm5, %v1178_v53 }
 0x301   : > { %v3810_v42 = vpop.f32.mrf.mxu2 }
 0x302   : > { %2095 = vst.msk [vmem:[%s3731_s18 + $0x88] sm:$0xff] %vm2077_vm11, %v3810_v42 }
 0x304   : > { %v1742_v51 = vpop.permute.xlu0 %1741  ;;  %v1841_v46 = vld [vmem:[#allocation2 + $0x78] sm:$0xff]  ;;  %v1754_v49 = vpop.permute.xlu1 %1753 }
 0x305   : > { %v1996_v44 = vpop.f32.mrf.mxu0  ;;  %1816 = vst.msk [vmem:[#allocation2 + $0xb0] sm:$0xff] %vm1793_vm9, %v1742_v51  ;;  %2539 = vmatmul.msk.f32.gmra.mxu1 %vm1863_vm10, %v1841_v46  ;;  %v1758_v3 = vpop.permute.xlu2 %1757 }
 0x306   : > { %2083 = vst.msk [vmem:[%s3731_s18 + $0x28] sm:$0xff] %vm2077_vm11, %v1996_v44  ;;  %v2114_v35 = vadd.f32 %v2113_v33, %v1996_v44  ;;  %v2153_v40 = vmul.f32 %v1996_v44, %v1996_v44 }
 0x307   : > { %1822 = vst.msk [vmem:[#allocation2 + $0xe0] sm:$0xff] %vm1793_vm9, %v1754_v49 }
 0x308   : > { %v2184_v39 = vadd.f32 %v2183_v1, %v2153_v40 }
 0x30c   : > { %v1370_v36 = vpop.permute.xlu0 %1369  ;;  %v1848_v29 = vld [vmem:[#allocation2 + $0xb0] sm:$0xff]  ;;  %v1551_v30 = vpop.permute.xlu1 %1550 }
 0x30d   : > { %1437 = vst.msk [vmem:[#allocation2 + $0xe8] sm:$0xff] %vm1407_vm6, %v1370_v36  ;;  %2546 = vmatmul.msk.f32.gmra.mxu2 %vm1863_vm10, %v1848_v29  ;;  %v1567_v12 = vpop.permute.xlu2 %1566 }
 0x30e   : > { %1624 = vst.msk [vmem:[#allocation2 + $0xb8] sm:$0xff] %vm1600_vm8, %v1551_v30  ;;  %v1854_v4 = vld [vmem:[#allocation2 + $0xe0] sm:$0xff]  ;;  %v2165_v30 = vmul.f32 %v3810_v42, %v3810_v42 }
 0x30f   : > { %1630 = vst.msk [vmem:[#allocation2 + $0xe8] sm:$0xff] %vm1600_vm8, %v1563_v41  ;;  %2552 = vmatmul.msk.f32.gmra.mxu3 %vm1863_vm10, %v1854_v4 }
 0x313   : > { %v2014_v45 = vpop.f32.mrf.mxu1 }
 0x314   : > { %2089 = vst.msk [vmem:[%s3731_s18 + $0x58] sm:$0xff] %vm2077_vm11, %v2014_v45  ;;  %v1744_v48 = vpop.permute.xlu0 %1743  ;;  %v1756_v0 = vpop.permute.xlu1 %1755  ;;  %v2159_v57 = vmul.f32 %v2014_v45, %v2014_v45 }
 0x315   : > { %1817 = vst.msk [vmem:[#allocation2 + $0xb8] sm:$0xff] %vm1793_vm9, %v1744_v48 }
 0x316   : > { %1823 = vst.msk [vmem:[#allocation2 + $0xe8] sm:$0xff] %vm1793_vm9, %v1756_v0 }
 0x31c   : > { %v1372_v2 = vpop.permute.xlu0 %1371  ;;  %v1849_v7 = vld [vmem:[#allocation2 + $0xb8] sm:$0xff]  ;;  %v1565_v5 = vpop.permute.xlu1 %1564 }
 0x31d   : > { %1438 = vst.msk [vmem:[#allocation2 + $0xf0] sm:$0xff] %vm1407_vm6, %v1372_v2  ;;  %2547 = vmatmul.msk.f32.gmra.mxu2 %vm1863_vm10, %v1849_v7  ;;  %v1855_v6 = vld [vmem:[#allocation2 + $0xe8] sm:$0xff] }
 0x31e   : > { %1631 = vst.msk [vmem:[#allocation2 + $0xf0] sm:$0xff] %vm1600_vm8, %v1565_v5  ;;  %2553 = vmatmul.msk.f32.gmra.mxu3 %vm1863_vm10, %v1855_v6 }
 0x31f   : > { %1824 = vst.msk [vmem:[#allocation2 + $0xf0] sm:$0xff] %vm1793_vm9, %v1758_v3 }
 0x320   : > { %v3834_v10 = vpop.f32.mrf.mxu3 }
 0x321   : > { %v3836_v8 = vpop.f32.mrf.mxu2  ;;  %2102 = vst.msk [vmem:[%s3731_s18 + $0xc0] sm:$0xff] %vm2077_vm11, %v3834_v10 }
 0x322   : > { %2096 = vst.msk [vmem:[%s3731_s18 + $0x90] sm:$0xff] %vm2077_vm11, %v3836_v8  ;;  %v2166_v48 = vmul.f32 %v3836_v8, %v3836_v8 }
 0x324   : > { %v1180_v9 = vpop.permute.xlu0 %1179  ;;  %v1374_v13 = vpop.permute.xlu1 %1373 }
 0x325   : > { %v1999_v11 = vpop.f32.mrf.mxu0  ;;  %1245 = vst.msk [vmem:[#allocation2 + $0xf8] sm:$0xff] %vm1213_vm5, %v1180_v9 }
 0x326   : > { %2084 = vst.msk [vmem:[%s3731_s18 + $0x30] sm:$0xff] %vm2077_vm11, %v1999_v11  ;;  %v2115_v60 = vadd.f32 %v2114_v35, %v1999_v11  ;;  %v2154_v16 = vmul.f32 %v1999_v11, %v1999_v11  ;;  %v1856_v14 = vld [vmem:[#allocation2 + $0xf0] sm:$0xff] }
 0x327   : > { %1439 = vst.msk [vmem:[#allocation2 + $0xf8] sm:$0xff] %vm1407_vm6, %v1374_v13  ;;  %2554 = vmatmul.msk.f32.gmra.mxu3 %vm1863_vm10, %v1856_v14 }
 0x328   : > { %v2185_v15 = vadd.f32 %v2184_v39, %v2154_v16  ;;  %1632 = vst.msk [vmem:[#allocation2 + $0xf8] sm:$0xff] %vm1600_vm8, %v1567_v12  ;;  %v2164_v39 = vmul.f32 %v3787_v27, %v3787_v27 }
 0x32c   : > { %v1760_v19 = vpop.permute.xlu0 %1759 }
 0x32d   : > { %1825 = vst.msk [vmem:[#allocation2 + $0xf8] sm:$0xff] %vm1793_vm9, %v1760_v19 }
 0x333   : > { %v2017_v18 = vpop.f32.mrf.mxu1 }
 0x334   : > { %2090 = vst.msk [vmem:[%s3731_s18 + $0x60] sm:$0xff] %vm2077_vm11, %v2017_v18  ;;  %v1857_v22 = vld [vmem:[#allocation2 + $0xf8] sm:$0xff]  ;;  %v2160_v33 = vmul.f32 %v2017_v18, %v2017_v18 }
 0x335   : > { %2555 = vmatmul.msk.f32.gmra.mxu3 %vm1863_vm10, %v1857_v22 }
 0x340   : > { %v3854_v20 = vpop.f32.mrf.mxu3 }
 0x341   : > { %v2038_v21 = vpop.f32.mrf.mxu2  ;;  %2103 = vst.msk [vmem:[%s3731_s18 + $0xc8] sm:$0xff] %vm2077_vm11, %v3854_v20 }
 0x342   : > { %2097 = vst.msk [vmem:[%s3731_s18 + $0x98] sm:$0xff] %vm2077_vm11, %v2038_v21  ;;  %v2167_v2 = vmul.f32 %v2038_v21, %v2038_v21 }
 0x345   : > { %v2002_v23 = vpop.f32.mrf.mxu0 }
 0x346   : > { %2085 = vst.msk [vmem:[%s3731_s18 + $0x38] sm:$0xff] %vm2077_vm11, %v2002_v23  ;;  %v2116_v25 = vadd.f32 %v2115_v60, %v2002_v23  ;;  %v2155_v24 = vmul.f32 %v2002_v23, %v2002_v23  ;;  %v2172_v23 = vmul.f32 %v3834_v10, %v3834_v10 }
 0x348   : > { %v2117_v28 = vadd.f32 %v2116_v25, %v3758_v63  ;;  %v2186_v26 = vadd.f32 %v2185_v15, %v2155_v24 }
 0x34a   : > { %v2118_v58 = vadd.f32 %v2117_v28, %v3770_v17  ;;  %v2187_v55 = vadd.f32 %v2186_v26, %v2156_v43  ;;  %v2173_v43 = vmul.f32 %v3854_v20, %v3854_v20 }
 0x34c   : > { %v2119_v54 = vadd.f32 %v2118_v58, %v3794_v37  ;;  %v2188_v52 = vadd.f32 %v2187_v55, %v2157_v47 }
 0x34e   : > { %v2189_v59 = vadd.f32 %v2188_v52, %v2158_v50  ;;  %v2120_v63 = vadd.f32 %v2119_v54, %v2014_v45 }
 0x350   : > { %v2121_v62 = vadd.f32 %v2120_v63, %v2017_v18  ;;  %v2190_v38 = vadd.f32 %v2189_v59, %v2159_v57 }
 0x352   : > { %v2020_v32 = vpop.f32.mrf.mxu1  ;;  %v2191_v17 = vadd.f32 %v2190_v38, %v2160_v33 }
 0x353   : > { %2091 = vst.msk [vmem:[%s3731_s18 + $0x68] sm:$0xff] %vm2077_vm11, %v2020_v32  ;;  %v2122_v56 = vadd.f32 %v2121_v62, %v2020_v32  ;;  %v2161_v1 = vmul.f32 %v2020_v32, %v2020_v32 }
 0x355   : > { %v2192_v61 = vadd.f32 %v2191_v17, %v2161_v1 }
 0x360   : > { %v2041_v37 = vpop.f32.mrf.mxu2 }
 0x361   : > { %2098 = vst.msk [vmem:[%s3731_s18 + $0xa0] sm:$0xff] %vm2077_vm11, %v2041_v37  ;;  %v2059_v41 = vpop.f32.mrf.mxu3 }
 0x362   : > { %2104 = vst.msk [vmem:[%s3731_s18 + $0xd0] sm:$0xff] %vm2077_vm11, %v2059_v41  ;;  %v2174_v47 = vmul.f32 %v2059_v41, %v2059_v41 }
 0x36a   : > { %v2023_v34 = vpop.f32.mrf.mxu1 }
 0x36b   : > { %2092 = vst.msk [vmem:[%s3731_s18 + $0x70] sm:$0xff] %vm2077_vm11, %v2023_v34  ;;  %v2162_v51 = vmul.f32 %v2023_v34, %v2023_v34  ;;  %v2123_v46 = vadd.f32 %v2122_v56, %v2023_v34 }
 0x36d   : > { %v2193_v44 = vadd.f32 %v2192_v61, %v2162_v51 }
 0x378   : > { %v2044_v31 = vpop.f32.mrf.mxu2 }
 0x379   : > { %2099 = vst.msk [vmem:[%s3731_s18 + $0xa8] sm:$0xff] %vm2077_vm11, %v2044_v31  ;;  %v2062_v53 = vpop.f32.mrf.mxu3  ;;  %v2169_v12 = vmul.f32 %v2044_v31, %v2044_v31 }
 0x37a   : > { %2105 = vst.msk [vmem:[%s3731_s18 + $0xd8] sm:$0xff] %vm2077_vm11, %v2062_v53  ;;  %v2175_v52 = vmul.f32 %v2062_v53, %v2062_v53 }
 0x382   : > { %v2026_v49 = vpop.f32.mrf.mxu1 }
 0x383   : > { %2093 = vst.msk [vmem:[%s3731_s18 + $0x78] sm:$0xff] %vm2077_vm11, %v2026_v49  ;;  %v2124_v35 = vadd.f32 %v2123_v46, %v2026_v49  ;;  %v2163_v40 = vmul.f32 %v2026_v49, %v2026_v49 }
 0x385   : > { %v2125_v36 = vadd.f32 %v2124_v35, %v3787_v27  ;;  %v2194_v29 = vadd.f32 %v2193_v44, %v2163_v40  ;;  %v2168_v27 = vmul.f32 %v2041_v37, %v2041_v37 }
 0x387   : > { %v2126_v4 = vadd.f32 %v2125_v36, %v3810_v42  ;;  %v2195_v45 = vadd.f32 %v2194_v29, %v2164_v39 }
 0x389   : > { %v2127_v0 = vadd.f32 %v2126_v4, %v3836_v8  ;;  %v2196_v3 = vadd.f32 %v2195_v45, %v2165_v30 }
 0x38b   : > { %v2197_v7 = vadd.f32 %v2196_v3, %v2166_v48  ;;  %v2128_v5 = vadd.f32 %v2127_v0, %v2038_v21 }
 0x38d   : > { %v2129_v6 = vadd.f32 %v2128_v5, %v2041_v37  ;;  %v2198_v9 = vadd.f32 %v2197_v7, %v2167_v2 }
 0x38f   : > { %v2199_v13 = vadd.f32 %v2198_v9, %v2168_v27  ;;  %v2130_v60 = vadd.f32 %v2129_v6, %v2044_v31 }
 0x390   : > { %v2047_v11 = vpop.f32.mrf.mxu2 }
 0x391   : > { %2100 = vst.msk [vmem:[%s3731_s18 + $0xb0] sm:$0xff] %vm2077_vm11, %v2047_v11  ;;  %v2170_v16 = vmul.f32 %v2047_v11, %v2047_v11  ;;  %v2200_v8 = vadd.f32 %v2199_v13, %v2169_v12  ;;  %v2131_v14 = vadd.f32 %v2130_v60, %v2047_v11 }
 0x392   : > { %v2065_v42 = vpop.f32.mrf.mxu3 }
 0x393   : > { %2106 = vst.msk [vmem:[%s3731_s18 + $0xe0] sm:$0xff] %vm2077_vm11, %v2065_v42  ;;  %v2201_v19 = vadd.f32 %v2200_v8, %v2170_v16  ;;  %v2176_v63 = vmul.f32 %v2065_v42, %v2065_v42 }
 0x3a0   : > { %v2050_v15 = vpop.f32.mrf.mxu2 }
 0x3a1   : > { %2101 = vst.msk [vmem:[%s3731_s18 + $0xb8] sm:$0xff] %vm2077_vm11, %v2050_v15  ;;  %v2132_v18 = vadd.f32 %v2131_v14, %v2050_v15  ;;  %v2171_v22 = vmul.f32 %v2050_v15, %v2050_v15  ;;  %v2068_v21 = vpop.f32.mrf.mxu3 }
 0x3a2   : > { %2107 = vst.msk [vmem:[%s3731_s18 + $0xe8] sm:$0xff] %vm2077_vm11, %v2068_v21  ;;  %v2177_v38 = vmul.f32 %v2068_v21, %v2068_v21 }
 0x3a3   : > { %v2133_v25 = vadd.f32 %v2132_v18, %v3834_v10  ;;  %v2202_v24 = vadd.f32 %v2201_v19, %v2171_v22 }
 0x3a5   : > { %v2134_v28 = vadd.f32 %v2133_v25, %v3854_v20  ;;  %v2203_v26 = vadd.f32 %v2202_v24, %v2172_v23 }
 0x3a7   : > { %v2135_v58 = vadd.f32 %v2134_v28, %v2059_v41  ;;  %v2204_v55 = vadd.f32 %v2203_v26, %v2173_v43 }
 0x3a9   : > { %v2205_v50 = vadd.f32 %v2204_v55, %v2174_v47  ;;  %v2136_v57 = vadd.f32 %v2135_v58, %v2062_v53 }
 0x3aa   : > { %v2071_v54 = vpop.f32.mrf.mxu3 }
 0x3ab   : > { %2108 = vst.msk [vmem:[%s3731_s18 + $0xf0] sm:$0xff] %vm2077_vm11, %v2071_v54  ;;  %v2206_v59 = vadd.f32 %v2205_v50, %v2175_v52  ;;  %v2137_v10 = vadd.f32 %v2136_v57, %v2065_v42  ;;  %v2178_v17 = vmul.f32 %v2071_v54, %v2071_v54 }
 0x3ad   : > { %v2207_v33 = vadd.f32 %v2206_v59, %v2176_v63  ;;  %v2138_v62 = vadd.f32 %v2137_v10, %v2068_v21 }
 0x3af   : > { %v2208_v32 = vadd.f32 %v2207_v33, %v2177_v38  ;;  %v2139_v20 = vadd.f32 %v2138_v62, %v2071_v54 }
 0x3b1   : > { %v2209_v1 = vadd.f32 %v2208_v32, %v2178_v17 }
 0x3b8   : > { %v2074_v56 = vpop.f32.mrf.mxu3 }
 0x3b9   : > { %2109 = vst.msk [vmem:[%s3731_s18 + $0xf8] sm:$0xff] %vm2077_vm11, %v2074_v56  ;;  %v2140_v61 = vadd.f32 %v2139_v20, %v2074_v56  ;;  %v2179_v37 = vmul.f32 %v2074_v56, %v2074_v56 }
 0x3bb   : > { %v2141_v41 = vrot.slane %v2140_v61, 4  ;;  %v2210_v34 = vadd.f32 %v2209_v1, %v2179_v37 }
 0x3bd   : > { %v2142_v31 = vadd.f32 %v2141_v41, %v2140_v61  ;;  %v2211_v53 = vrot.slane %v2210_v34, 4 }
 0x3bf   : > { %v2143_v51 = vrot.slane %v2142_v31, 2  ;;  %v2212_v46 = vadd.f32 %v2211_v53, %v2210_v34 }
 0x3c1   : > { %v2144_v49 = vadd.f32 %v2143_v51, %v2142_v31  ;;  %v2213_v44 = vrot.slane %v2212_v46, 2 }
 0x3c3   : > { %v2145_v35 = vrot.slane %v2144_v49, 1  ;;  %v2214_v40 = vadd.f32 %v2213_v44, %v2212_v46 }
 0x3c5   : > { %v2146_v39 = vadd.f32 %v2145_v35, %v2144_v49  ;;  %v2215_v36 = vrot.slane %v2214_v40, 1 }
 0x3c7   : > { %2147 = vst [vmem:[%s211_s21] sm:$0x1] %v2146_v39  ;;  %v2216_v29 = vadd.f32 %v2215_v36, %v2214_v40 }
 0x3c9   : > { %2217 = vst [vmem:[%s214_s24] sm:$0x1] %v2216_v29 }
 0x3ca PF: > { %s15_s15 = sadd.s32 1, %s2597_s15  }
 0x3cb   : > { %p12_p4 = scmp.ge.s32.totalorder %s15_s15, 4  }
 0x3cd   :  { %14 = sbr.rel (!%p12_p4) target bundleno = 1 (0x1), region = 84 }

</bundles_post_ra>
